<compile_context>
chip_gen: v5e
topology: v5e:2x2
jax: 0.10.0
libtpu: 0.0.40
codegen_flags: <defaults>
</compile_context>

<pallas_src>
import jax
import jax.numpy as jnp
from jax.experimental import pallas as pl
from jax.experimental.pallas import tpu as pltpu


def _round_up(x, m):
    return (x + m - 1) // m * m


def _hausdorff_kernel(a_rm2_ref, a_cm2_ref, a_sq_ref, a_m_ref,
                      b_r_ref, b_c_ref, b_sq_ref, b_m_ref,
                      out_ref, row_acc, col_acc, h2_acc):
    i = pl.program_id(0)
    j = pl.program_id(1)
    n_i = pl.num_programs(0)
    n_j = pl.num_programs(1)

    @pl.when(jnp.logical_and(i == 0, j == 0))
    def _():
        h2_acc[...] = jnp.full((1, 1), -jnp.inf, dtype=jnp.float32)

    # Pairwise squared distances with "not in A"/"not in B" penalties already
    # folded into the per-point squared-norm terms:
    #   d2[r, c] = ||p_r - q_c||^2 + penA[r] + penB[c]
    cross = a_rm2_ref[...] * b_r_ref[...] + a_cm2_ref[...] * b_c_ref[...]  # (TM, TN)
    d2 = cross + a_sq_ref[...] + b_sq_ref[...]                             # (TM, TN)

    tm, tn = d2.shape

    # ---- deferred row-min (VPU only): fold lane chunks into a (TM, 128) partial
    rloc = d2[:, 0:128]
    for k in range(1, tn // 128):
        rloc = jnp.minimum(rloc, d2[:, k * 128:(k + 1) * 128])

    @pl.when(j == 0)
    def _():
        row_acc[...] = rloc

    @pl.when(j > 0)
    def _():
        row_acc[...] = jnp.minimum(row_acc[...], rloc)

    # ---- deferred col-min (VPU only): fold sublane chunks into an (8, TN) partial
    cloc = d2[0:8, :]
    for k in range(1, tm // 8):
        cloc = jnp.minimum(cloc, d2[k * 8:(k + 1) * 8, :])

    @pl.when(i == 0)
    def _():
        col_acc[j] = cloc

    @pl.when(i > 0)
    def _():
        col_acc[j] = jnp.minimum(col_acc[j], cloc)

    # ---- finalize directed h(A, B)^2 contribution of this row tile ------------
    @pl.when(j == n_j - 1)
    def _():
        rmin = jnp.min(row_acc[...], axis=1, keepdims=True)          # (TM, 1)
        cand = jnp.max(jnp.where(a_m_ref[...] > 0.0, rmin, -jnp.inf),
                       axis=0, keepdims=True)                        # (1, 1)
        h2_acc[...] = jnp.maximum(h2_acc[...], cand)

    # ---- finalize directed h(B, A)^2 contribution of this column tile ---------
    @pl.when(i == n_i - 1)
    def _():
        cmin = jnp.min(col_acc[j], axis=0, keepdims=True)            # (1, TN)
        cand = jnp.max(jnp.where(b_m_ref[...] > 0.0, cmin, -jnp.inf),
                       axis=1, keepdims=True)                        # (1, 1)
        h2_acc[...] = jnp.maximum(h2_acc[...], cand)

    @pl.when(jnp.logical_and(i == n_i - 1, j == n_j - 1))
    def _():
        out_ref[...] = jnp.sqrt(h2_acc[...])


def hausdorff_distance(input_mask, target_mask, *, tm=256, tn=1024):
    """Pallas TPU Hausdorff distance between two (H, W) binary masks."""
    assert input_mask.shape == target_mask.shape and input_mask.ndim == 2
    H, W = input_mask.shape
    N = H * W

    # ---- plain-JAX glue: coordinates, masks, penalty-baked squared norms ------
    rr, cc = jnp.meshgrid(jnp.arange(H, dtype=jnp.float32),
                          jnp.arange(W, dtype=jnp.float32), indexing="ij")
    rows = rr.reshape(-1)
    cols = cc.reshape(-1)
    ma = (input_mask != 0).astype(jnp.float32).reshape(-1)
    mb = (target_mask != 0).astype(jnp.float32).reshape(-1)

    # Finite sentinel strictly greater than any real squared distance.
    max_d2 = float((H - 1) ** 2 + (W - 1) ** 2)
    big = 8.0 * (max_d2 + 1.0)

    sq = rows * rows + cols * cols
    a_sqpen = sq + big * (1.0 - ma)   # penalize points not in A (rows of d2)
    b_sqpen = sq + big * (1.0 - mb)   # penalize points not in B (cols of d2)

    # ---- tile sizes (clamped for small problems) ------------------------------
    TN = min(tn, _round_up(N, 128))   # lanes, multiple of 128
    TM = min(tm, _round_up(N, 8))     # sublanes, multiple of 8
    n_r = _round_up(N, TM)            # padded length for the A (row) side
    n_c = _round_up(N, TN)            # padded length for the B (column) side
    n_i, n_j = n_r // TM, n_c // TN

    def pad1d(x, n, value):
        return jnp.pad(x, (0, n - x.shape[0]), constant_values=value)

    # Row (A) side: column-oriented (n_r, 1); padded points get mask=0, pen=BIG.
    a_rm2 = pad1d(-2.0 * rows, n_r, 0.0).reshape(n_r, 1)
    a_cm2 = pad1d(-2.0 * cols, n_r, 0.0).reshape(n_r, 1)
    a_sq = pad1d(a_sqpen, n_r, big).reshape(n_r, 1)
    a_m = pad1d(ma, n_r, 0.0).reshape(n_r, 1)

    # Column (B) side: lane-dense (1, n_c).
    b_r = pad1d(rows, n_c, 0.0).reshape(1, n_c)
    b_c = pad1d(cols, n_c, 0.0).reshape(1, n_c)
    b_sq = pad1d(b_sqpen, n_c, big).reshape(1, n_c)
    b_m = pad1d(mb, n_c, 0.0).reshape(1, n_c)

    out = pl.pallas_call(
        _hausdorff_kernel,
        out_shape=jax.ShapeDtypeStruct((1, 1), jnp.float32),
        grid=(n_i, n_j),
        in_specs=[
            pl.BlockSpec((TM, 1), lambda i, j: (i, 0)),
            pl.BlockSpec((TM, 1), lambda i, j: (i, 0)),
            pl.BlockSpec((TM, 1), lambda i, j: (i, 0)),
            pl.BlockSpec((TM, 1), lambda i, j: (i, 0)),
            pl.BlockSpec((1, TN), lambda i, j: (0, j)),
            pl.BlockSpec((1, TN), lambda i, j: (0, j)),
            pl.BlockSpec((1, TN), lambda i, j: (0, j)),
            pl.BlockSpec((1, TN), lambda i, j: (0, j)),
        ],
        out_specs=pl.BlockSpec((1, 1), lambda i, j: (0, 0)),
        scratch_shapes=[
            pltpu.VMEM((TM, 128), jnp.float32),      # deferred row-min partial
            pltpu.VMEM((n_j, 8, TN), jnp.float32),   # deferred col-min partials
            pltpu.VMEM((1, 1), jnp.float32),         # max(h_AB^2, h_BA^2)
        ],
        compiler_params=pltpu.CompilerParams(
            dimension_semantics=("arbitrary", "arbitrary"),
            vmem_limit_bytes=32 * 1024 * 1024,
        ),
    )(a_rm2, a_cm2, a_sq, a_m, b_r, b_c, b_sq, b_m)
    return out[0, 0]


def _hausdorff_reference(input_mask, target_mask):
    """Pure-JAX reference with identical math (for a sanity check)."""
    H, W = input_mask.shape
    rr, cc = jnp.meshgrid(jnp.arange(H, dtype=jnp.float32),
                          jnp.arange(W, dtype=jnp.float32), indexing="ij")
    rows = rr.reshape(-1)
    cols = cc.reshape(-1)
    d2 = (rows[:, None] - rows[None, :]) ** 2 + (cols[:, None] - cols[None, :]) ** 2
    ma = (input_mask != 0).reshape(-1)
    mb = (target_mask != 0).reshape(-1)
    d_ab = jnp.where(mb[None, :], d2, jnp.inf)
    h_ab2 = jnp.max(jnp.where(ma, jnp.min(d_ab, axis=1), -jnp.inf))
    d_ba = jnp.where(ma[:, None], d2, jnp.inf)
    h_ba2 = jnp.max(jnp.where(mb, jnp.min(d_ba, axis=0), -jnp.inf))
    return jnp.sqrt(jnp.maximum(h_ab2, h_ba2))


if __name__ == "__main__":
    H, W = 16, 16
    key = jax.random.PRNGKey(0)
    ka, kb = jax.random.split(key)

    # Deterministic synthetic binary masks (the module has no learned parameters).
    input_mask = (jax.random.uniform(ka, (H, W)) < 0.3).astype(jnp.float32)
    target_mask = (jax.random.uniform(kb, (H, W)) < 0.3).astype(jnp.float32)
    # Guarantee both point sets are non-empty (SimpleITK errors on empty masks).
    input_mask = input_mask.at[0, 0].set(1.0)
    target_mask = target_mask.at[H - 1, W - 1].set(1.0)

    hd = hausdorff_distance(input_mask, target_mask)
    hd = jax.block_until_ready(hd)

    ref = jax.block_until_ready(_hausdorff_reference(input_mask, target_mask))
    assert jnp.allclose(hd, ref, rtol=1e-5, atol=1e-5), (hd, ref)

    print("KERNEL_OK")
</pallas_src>

<mosaic_0001>
module attributes {stable_mosaic.version = 11 : i64} {
  func.func @_hausdorff_kernel(%arg0: i32, %arg1: i32, %arg2: memref<256x1xf32, #tpu.memory_space<vmem>>, %arg3: memref<256x1xf32, #tpu.memory_space<vmem>>, %arg4: memref<256x1xf32, #tpu.memory_space<vmem>>, %arg5: memref<256x1xf32, #tpu.memory_space<vmem>>, %arg6: memref<1x256xf32, #tpu.memory_space<vmem>>, %arg7: memref<1x256xf32, #tpu.memory_space<vmem>>, %arg8: memref<1x256xf32, #tpu.memory_space<vmem>>, %arg9: memref<1x256xf32, #tpu.memory_space<vmem>>, %arg10: memref<1x1xf32, #tpu.memory_space<vmem>>, %arg11: memref<256x128xf32, #tpu.memory_space<vmem>>, %arg12: memref<1x8x256xf32, #tpu.memory_space<vmem>>, %arg13: memref<1x1xf32, #tpu.memory_space<vmem>>) attributes {dimension_semantics = [#tpu.dimension_semantics<arbitrary>, #tpu.dimension_semantics<arbitrary>], iteration_bounds = array<i64: 1, 1>, scalar_prefetch = 0 : i64, scratch_operands = 3 : i64, tpu.core_type = #tpu.core_type<tc>, window_params = [{transform_indices = @transform_0, window_bounds = array<i64: 256, 1>}, {transform_indices = @transform_1, window_bounds = array<i64: 256, 1>}, {transform_indices = @transform_2, window_bounds = array<i64: 256, 1>}, {transform_indices = @transform_3, window_bounds = array<i64: 256, 1>}, {transform_indices = @transform_4, window_bounds = array<i64: 1, 256>}, {transform_indices = @transform_5, window_bounds = array<i64: 1, 256>}, {transform_indices = @transform_6, window_bounds = array<i64: 1, 256>}, {transform_indices = @transform_7, window_bounds = array<i64: 1, 256>}, {pipeline_mode = #tpu.pipeline_mode<synchronous>, transform_indices = @transform_8, window_bounds = array<i64: 1, 1>}]} {
    %c0_i32 = arith.constant 0 : i32
    %0 = arith.cmpi eq, %arg0, %c0_i32 : i32
    %c0_i32_0 = arith.constant 0 : i32
    %1 = arith.cmpi eq, %arg1, %c0_i32_0 : i32
    %2 = arith.andi %0, %1 : i1
    %3 = arith.extui %2 : i1 to i32
    %c0_i32_1 = arith.constant 0 : i32
    %4 = arith.cmpi ne, %3, %c0_i32_1 : i32
    scf.if %4 {
      %cst = arith.constant 0xFF800000 : f32
      %111 = vector.broadcast %cst : f32 to vector<1x1xf32>
      %c0_28 = arith.constant 0 : index
      %c0_29 = arith.constant 0 : index
      %112 = vector.load %arg13[%c0_28, %c0_29] : memref<1x1xf32, #tpu.memory_space<vmem>>, vector<1x1xf32>
      tpu.vector_store %arg13[%c0_28, %c0_29], %111 {strides = array<i32>} : memref<1x1xf32, #tpu.memory_space<vmem>>, vector<1x1xf32>,
    } else {
    }
    %c0 = arith.constant 0 : index
    %c0_2 = arith.constant 0 : index
    %5 = vector.load %arg2[%c0, %c0_2] : memref<256x1xf32, #tpu.memory_space<vmem>>, vector<256x1xf32>
    %c0_3 = arith.constant 0 : index
    %c0_4 = arith.constant 0 : index
    %6 = vector.load %arg6[%c0_3, %c0_4] : memref<1x256xf32, #tpu.memory_space<vmem>>, vector<1x256xf32>
    %7 = vector.broadcast %5 : vector<256x1xf32> to vector<256x256xf32>
    %8 = vector.broadcast %6 : vector<1x256xf32> to vector<256x256xf32>
    %9 = arith.mulf %7, %8 : vector<256x256xf32>
    %c0_5 = arith.constant 0 : index
    %c0_6 = arith.constant 0 : index
    %10 = vector.load %arg3[%c0_5, %c0_6] : memref<256x1xf32, #tpu.memory_space<vmem>>, vector<256x1xf32>
    %c0_7 = arith.constant 0 : index
    %c0_8 = arith.constant 0 : index
    %11 = vector.load %arg7[%c0_7, %c0_8] : memref<1x256xf32, #tpu.memory_space<vmem>>, vector<1x256xf32>
    %12 = vector.broadcast %10 : vector<256x1xf32> to vector<256x256xf32>
    %13 = vector.broadcast %11 : vector<1x256xf32> to vector<256x256xf32>
    %14 = arith.mulf %12, %13 : vector<256x256xf32>
    %15 = arith.addf %9, %14 : vector<256x256xf32>
    %c0_9 = arith.constant 0 : index
    %c0_10 = arith.constant 0 : index
    %16 = vector.load %arg4[%c0_9, %c0_10] : memref<256x1xf32, #tpu.memory_space<vmem>>, vector<256x1xf32>
    %17 = vector.broadcast %16 : vector<256x1xf32> to vector<256x256xf32>
    %18 = arith.addf %15, %17 : vector<256x256xf32>
    %c0_11 = arith.constant 0 : index
    %c0_12 = arith.constant 0 : index
    %19 = vector.load %arg8[%c0_11, %c0_12] : memref<1x256xf32, #tpu.memory_space<vmem>>, vector<1x256xf32>
    %20 = vector.broadcast %19 : vector<1x256xf32> to vector<256x256xf32>
    %21 = arith.addf %18, %20 : vector<256x256xf32>
    %22 = vector.extract_strided_slice %21 {offsets = [0, 0], sizes = [256, 128], strides = [1, 1]} : vector<256x256xf32> to vector<256x128xf32>
    %23 = vector.extract_strided_slice %21 {offsets = [0, 128], sizes = [256, 128], strides = [1, 1]} : vector<256x256xf32> to vector<256x128xf32>
    %24 = arith.minimumf %22, %23 : vector<256x128xf32>
    %c0_i32_13 = arith.constant 0 : i32
    %25 = arith.cmpi eq, %arg1, %c0_i32_13 : i32
    %26 = arith.extui %25 : i1 to i32
    %c0_i32_14 = arith.constant 0 : i32
    %27 = arith.cmpi ne, %26, %c0_i32_14 : i32
    scf.if %27 {
      %c0_28 = arith.constant 0 : index
      %c0_29 = arith.constant 0 : index
      %111 = vector.load %arg11[%c0_28, %c0_29] : memref<256x128xf32, #tpu.memory_space<vmem>>, vector<256x128xf32>
      tpu.vector_store %arg11[%c0_28, %c0_29], %24 {strides = array<i32>} : memref<256x128xf32, #tpu.memory_space<vmem>>, vector<256x128xf32>,
    } else {
    }
    %c0_i32_15 = arith.constant 0 : i32
    %28 = arith.cmpi sgt, %arg1, %c0_i32_15 : i32
    %29 = arith.extui %28 : i1 to i32
    %c0_i32_16 = arith.constant 0 : i32
    %30 = arith.cmpi ne, %29, %c0_i32_16 : i32
    scf.if %30 {
      %c0_28 = arith.constant 0 : index
      %c0_29 = arith.constant 0 : index
      %111 = vector.load %arg11[%c0_28, %c0_29] : memref<256x128xf32, #tpu.memory_space<vmem>>, vector<256x128xf32>
      %112 = arith.minimumf %111, %24 : vector<256x128xf32>
      %c0_30 = arith.constant 0 : index
      %c0_31 = arith.constant 0 : index
      %113 = vector.load %arg11[%c0_30, %c0_31] : memref<256x128xf32, #tpu.memory_space<vmem>>, vector<256x128xf32>
      tpu.vector_store %arg11[%c0_30, %c0_31], %112 {strides = array<i32>} : memref<256x128xf32, #tpu.memory_space<vmem>>, vector<256x128xf32>,
    } else {
    }
    %31 = vector.extract_strided_slice %21 {offsets = [0, 0], sizes = [8, 256], strides = [1, 1]} : vector<256x256xf32> to vector<8x256xf32>
    %32 = vector.extract_strided_slice %21 {offsets = [8, 0], sizes = [8, 256], strides = [1, 1]} : vector<256x256xf32> to vector<8x256xf32>
    %33 = arith.minimumf %31, %32 : vector<8x256xf32>
    %34 = vector.extract_strided_slice %21 {offsets = [16, 0], sizes = [8, 256], strides = [1, 1]} : vector<256x256xf32> to vector<8x256xf32>
    %35 = arith.minimumf %33, %34 : vector<8x256xf32>
    %36 = vector.extract_strided_slice %21 {offsets = [24, 0], sizes = [8, 256], strides = [1, 1]} : vector<256x256xf32> to vector<8x256xf32>
    %37 = arith.minimumf %35, %36 : vector<8x256xf32>
    %38 = vector.extract_strided_slice %21 {offsets = [32, 0], sizes = [8, 256], strides = [1, 1]} : vector<256x256xf32> to vector<8x256xf32>
    %39 = arith.minimumf %37, %38 : vector<8x256xf32>
    %40 = vector.extract_strided_slice %21 {offsets = [40, 0], sizes = [8, 256], strides = [1, 1]} : vector<256x256xf32> to vector<8x256xf32>
    %41 = arith.minimumf %39, %40 : vector<8x256xf32>
    %42 = vector.extract_strided_slice %21 {offsets = [48, 0], sizes = [8, 256], strides = [1, 1]} : vector<256x256xf32> to vector<8x256xf32>
    %43 = arith.minimumf %41, %42 : vector<8x256xf32>
    %44 = vector.extract_strided_slice %21 {offsets = [56, 0], sizes = [8, 256], strides = [1, 1]} : vector<256x256xf32> to vector<8x256xf32>
    %45 = arith.minimumf %43, %44 : vector<8x256xf32>
    %46 = vector.extract_strided_slice %21 {offsets = [64, 0], sizes = [8, 256], strides = [1, 1]} : vector<256x256xf32> to vector<8x256xf32>
    %47 = arith.minimumf %45, %46 : vector<8x256xf32>
    %48 = vector.extract_strided_slice %21 {offsets = [72, 0], sizes = [8, 256], strides = [1, 1]} : vector<256x256xf32> to vector<8x256xf32>
    %49 = arith.minimumf %47, %48 : vector<8x256xf32>
    %50 = vector.extract_strided_slice %21 {offsets = [80, 0], sizes = [8, 256], strides = [1, 1]} : vector<256x256xf32> to vector<8x256xf32>
    %51 = arith.minimumf %49, %50 : vector<8x256xf32>
    %52 = vector.extract_strided_slice %21 {offsets = [88, 0], sizes = [8, 256], strides = [1, 1]} : vector<256x256xf32> to vector<8x256xf32>
    %53 = arith.minimumf %51, %52 : vector<8x256xf32>
    %54 = vector.extract_strided_slice %21 {offsets = [96, 0], sizes = [8, 256], strides = [1, 1]} : vector<256x256xf32> to vector<8x256xf32>
    %55 = arith.minimumf %53, %54 : vector<8x256xf32>
    %56 = vector.extract_strided_slice %21 {offsets = [104, 0], sizes = [8, 256], strides = [1, 1]} : vector<256x256xf32> to vector<8x256xf32>
    %57 = arith.minimumf %55, %56 : vector<8x256xf32>
    %58 = vector.extract_strided_slice %21 {offsets = [112, 0], sizes = [8, 256], strides = [1, 1]} : vector<256x256xf32> to vector<8x256xf32>
    %59 = arith.minimumf %57, %58 : vector<8x256xf32>
    %60 = vector.extract_strided_slice %21 {offsets = [120, 0], sizes = [8, 256], strides = [1, 1]} : vector<256x256xf32> to vector<8x256xf32>
    %61 = arith.minimumf %59, %60 : vector<8x256xf32>
    %62 = vector.extract_strided_slice %21 {offsets = [128, 0], sizes = [8, 256], strides = [1, 1]} : vector<256x256xf32> to vector<8x256xf32>
    %63 = arith.minimumf %61, %62 : vector<8x256xf32>
    %64 = vector.extract_strided_slice %21 {offsets = [136, 0], sizes = [8, 256], strides = [1, 1]} : vector<256x256xf32> to vector<8x256xf32>
    %65 = arith.minimumf %63, %64 : vector<8x256xf32>
    %66 = vector.extract_strided_slice %21 {offsets = [144, 0], sizes = [8, 256], strides = [1, 1]} : vector<256x256xf32> to vector<8x256xf32>
    %67 = arith.minimumf %65, %66 : vector<8x256xf32>
    %68 = vector.extract_strided_slice %21 {offsets = [152, 0], sizes = [8, 256], strides = [1, 1]} : vector<256x256xf32> to vector<8x256xf32>
    %69 = arith.minimumf %67, %68 : vector<8x256xf32>
    %70 = vector.extract_strided_slice %21 {offsets = [160, 0], sizes = [8, 256], strides = [1, 1]} : vector<256x256xf32> to vector<8x256xf32>
    %71 = arith.minimumf %69, %70 : vector<8x256xf32>
    %72 = vector.extract_strided_slice %21 {offsets = [168, 0], sizes = [8, 256], strides = [1, 1]} : vector<256x256xf32> to vector<8x256xf32>
    %73 = arith.minimumf %71, %72 : vector<8x256xf32>
    %74 = vector.extract_strided_slice %21 {offsets = [176, 0], sizes = [8, 256], strides = [1, 1]} : vector<256x256xf32> to vector<8x256xf32>
    %75 = arith.minimumf %73, %74 : vector<8x256xf32>
    %76 = vector.extract_strided_slice %21 {offsets = [184, 0], sizes = [8, 256], strides = [1, 1]} : vector<256x256xf32> to vector<8x256xf32>
    %77 = arith.minimumf %75, %76 : vector<8x256xf32>
    %78 = vector.extract_strided_slice %21 {offsets = [192, 0], sizes = [8, 256], strides = [1, 1]} : vector<256x256xf32> to vector<8x256xf32>
    %79 = arith.minimumf %77, %78 : vector<8x256xf32>
    %80 = vector.extract_strided_slice %21 {offsets = [200, 0], sizes = [8, 256], strides = [1, 1]} : vector<256x256xf32> to vector<8x256xf32>
    %81 = arith.minimumf %79, %80 : vector<8x256xf32>
    %82 = vector.extract_strided_slice %21 {offsets = [208, 0], sizes = [8, 256], strides = [1, 1]} : vector<256x256xf32> to vector<8x256xf32>
    %83 = arith.minimumf %81, %82 : vector<8x256xf32>
    %84 = vector.extract_strided_slice %21 {offsets = [216, 0], sizes = [8, 256], strides = [1, 1]} : vector<256x256xf32> to vector<8x256xf32>
    %85 = arith.minimumf %83, %84 : vector<8x256xf32>
    %86 = vector.extract_strided_slice %21 {offsets = [224, 0], sizes = [8, 256], strides = [1, 1]} : vector<256x256xf32> to vector<8x256xf32>
    %87 = arith.minimumf %85, %86 : vector<8x256xf32>
    %88 = vector.extract_strided_slice %21 {offsets = [232, 0], sizes = [8, 256], strides = [1, 1]} : vector<256x256xf32> to vector<8x256xf32>
    %89 = arith.minimumf %87, %88 : vector<8x256xf32>
    %90 = vector.extract_strided_slice %21 {offsets = [240, 0], sizes = [8, 256], strides = [1, 1]} : vector<256x256xf32> to vector<8x256xf32>
    %91 = arith.minimumf %89, %90 : vector<8x256xf32>
    %92 = vector.extract_strided_slice %21 {offsets = [248, 0], sizes = [8, 256], strides = [1, 1]} : vector<256x256xf32> to vector<8x256xf32>
    %93 = arith.minimumf %91, %92 : vector<8x256xf32>
    %c0_i32_17 = arith.constant 0 : i32
    %94 = arith.cmpi eq, %arg0, %c0_i32_17 : i32
    %95 = arith.extui %94 : i1 to i32
    %c0_i32_18 = arith.constant 0 : i32
    %96 = arith.cmpi ne, %95, %c0_i32_18 : i32
    scf.if %96 {
      %111 = arith.index_cast %arg1 : i32 to index
      %c0_28 = arith.constant 0 : index
      %c0_29 = arith.constant 0 : index
      %112 = vector.load %arg12[%111, %c0_28, %c0_29] : memref<1x8x256xf32, #tpu.memory_space<vmem>>, vector<1x8x256xf32>
      %113 = vector.shape_cast %112 : vector<1x8x256xf32> to vector<8x256xf32>
      %114 = vector.shape_cast %93 : vector<8x256xf32> to vector<1x8x256xf32>
      tpu.vector_store %arg12[%111, %c0_28, %c0_29], %114 {strides = array<i32>} : memref<1x8x256xf32, #tpu.memory_space<vmem>>, vector<1x8x256xf32>,
    } else {
    }
    %c0_i32_19 = arith.constant 0 : i32
    %97 = arith.cmpi sgt, %arg0, %c0_i32_19 : i32
    %98 = arith.extui %97 : i1 to i32
    %c0_i32_20 = arith.constant 0 : i32
    %99 = arith.cmpi ne, %98, %c0_i32_20 : i32
    scf.if %99 {
      %111 = arith.index_cast %arg1 : i32 to index
      %c0_28 = arith.constant 0 : index
      %c0_29 = arith.constant 0 : index
      %112 = vector.load %arg12[%111, %c0_28, %c0_29] : memref<1x8x256xf32, #tpu.memory_space<vmem>>, vector<1x8x256xf32>
      %113 = vector.shape_cast %112 : vector<1x8x256xf32> to vector<8x256xf32>
      %114 = arith.minimumf %113, %93 : vector<8x256xf32>
      %115 = arith.index_cast %arg1 : i32 to index
      %c0_30 = arith.constant 0 : index
      %c0_31 = arith.constant 0 : index
      %116 = vector.load %arg12[%115, %c0_30, %c0_31] : memref<1x8x256xf32, #tpu.memory_space<vmem>>, vector<1x8x256xf32>
      %117 = vector.shape_cast %116 : vector<1x8x256xf32> to vector<8x256xf32>
      %118 = vector.shape_cast %114 : vector<8x256xf32> to vector<1x8x256xf32>
      tpu.vector_store %arg12[%115, %c0_30, %c0_31], %118 {strides = array<i32>} : memref<1x8x256xf32, #tpu.memory_space<vmem>>, vector<1x8x256xf32>,
    } else {
    }
    %c0_i32_21 = arith.constant 0 : i32
    %100 = arith.cmpi eq, %arg1, %c0_i32_21 : i32
    %101 = arith.extui %100 : i1 to i32
    %c0_i32_22 = arith.constant 0 : i32
    %102 = arith.cmpi ne, %101, %c0_i32_22 : i32
    scf.if %102 {
      %c0_28 = arith.constant 0 : index
      %c0_29 = arith.constant 0 : index
      %111 = vector.load %arg11[%c0_28, %c0_29] : memref<256x128xf32, #tpu.memory_space<vmem>>, vector<256x128xf32>
      %cst = arith.constant dense<0x7F800000> : vector<256xf32>
      %112 = vector.multi_reduction <minimumf>, %111, %cst [1] : vector<256x128xf32> to vector<256xf32>
      %113 = vector.shape_cast %112 : vector<256xf32> to vector<256x1xf32>
      %c0_30 = arith.constant 0 : index
      %c0_31 = arith.constant 0 : index
      %114 = vector.load %arg5[%c0_30, %c0_31] : memref<256x1xf32, #tpu.memory_space<vmem>>, vector<256x1xf32>
      %cst_32 = arith.constant 0.000000e+00 : f32
      %115 = vector.broadcast %cst_32 : f32 to vector<256x1xf32>
      %116 = arith.cmpf ogt, %114, %115 : vector<256x1xf32>
      %cst_33 = arith.constant 0xFF800000 : f32
      %117 = vector.broadcast %cst_33 : f32 to vector<256x1xf32>
      %118 = arith.select %116, %113, %117 : vector<256x1xi1>, vector<256x1xf32>
      %cst_34 = arith.constant dense<0xFF800000> : vector<1xf32>
      %119 = vector.multi_reduction <maximumf>, %118, %cst_34 [0] : vector<256x1xf32> to vector<1xf32>
      %120 = vector.shape_cast %119 : vector<1xf32> to vector<1x1xf32>
      %c0_35 = arith.constant 0 : index
      %c0_36 = arith.constant 0 : index
      %121 = vector.load %arg13[%c0_35, %c0_36] : memref<1x1xf32, #tpu.memory_space<vmem>>, vector<1x1xf32>
      %122 = arith.maximumf %121, %120 : vector<1x1xf32>
      %c0_37 = arith.constant 0 : index
      %c0_38 = arith.constant 0 : index
      %123 = vector.load %arg13[%c0_37, %c0_38] : memref<1x1xf32, #tpu.memory_space<vmem>>, vector<1x1xf32>
      tpu.vector_store %arg13[%c0_37, %c0_38], %122 {strides = array<i32>} : memref<1x1xf32, #tpu.memory_space<vmem>>, vector<1x1xf32>,
    } else {
    }
    %c0_i32_23 = arith.constant 0 : i32
    %103 = arith.cmpi eq, %arg0, %c0_i32_23 : i32
    %104 = arith.extui %103 : i1 to i32
    %c0_i32_24 = arith.constant 0 : i32
    %105 = arith.cmpi ne, %104, %c0_i32_24 : i32
    scf.if %105 {
      %111 = arith.index_cast %arg1 : i32 to index
      %c0_28 = arith.constant 0 : index
      %c0_29 = arith.constant 0 : index
      %112 = vector.load %arg12[%111, %c0_28, %c0_29] : memref<1x8x256xf32, #tpu.memory_space<vmem>>, vector<1x8x256xf32>
      %113 = vector.shape_cast %112 : vector<1x8x256xf32> to vector<8x256xf32>
      %cst = arith.constant dense<0x7F800000> : vector<256xf32>
      %114 = vector.multi_reduction <minimumf>, %113, %cst [0] : vector<8x256xf32> to vector<256xf32>
      %115 = vector.shape_cast %114 : vector<256xf32> to vector<1x256xf32>
      %c0_30 = arith.constant 0 : index
      %c0_31 = arith.constant 0 : index
      %116 = vector.load %arg9[%c0_30, %c0_31] : memref<1x256xf32, #tpu.memory_space<vmem>>, vector<1x256xf32>
      %cst_32 = arith.constant 0.000000e+00 : f32
      %117 = vector.broadcast %cst_32 : f32 to vector<1x256xf32>
      %118 = arith.cmpf ogt, %116, %117 : vector<1x256xf32>
      %cst_33 = arith.constant 0xFF800000 : f32
      %119 = vector.broadcast %cst_33 : f32 to vector<1x256xf32>
      %120 = arith.select %118, %115, %119 : vector<1x256xi1>, vector<1x256xf32>
      %cst_34 = arith.constant dense<0xFF800000> : vector<1xf32>
      %121 = vector.multi_reduction <maximumf>, %120, %cst_34 [1] : vector<1x256xf32> to vector<1xf32>
      %122 = vector.shape_cast %121 : vector<1xf32> to vector<1x1xf32>
      %c0_35 = arith.constant 0 : index
      %c0_36 = arith.constant 0 : index
      %123 = vector.load %arg13[%c0_35, %c0_36] : memref<1x1xf32, #tpu.memory_space<vmem>>, vector<1x1xf32>
      %124 = arith.maximumf %123, %122 : vector<1x1xf32>
      %c0_37 = arith.constant 0 : index
      %c0_38 = arith.constant 0 : index
      %125 = vector.load %arg13[%c0_37, %c0_38] : memref<1x1xf32, #tpu.memory_space<vmem>>, vector<1x1xf32>
      tpu.vector_store %arg13[%c0_37, %c0_38], %124 {strides = array<i32>} : memref<1x1xf32, #tpu.memory_space<vmem>>, vector<1x1xf32>,
    } else {
    }
    %c0_i32_25 = arith.constant 0 : i32
    %106 = arith.cmpi eq, %arg0, %c0_i32_25 : i32
    %c0_i32_26 = arith.constant 0 : i32
    %107 = arith.cmpi eq, %arg1, %c0_i32_26 : i32
    %108 = arith.andi %106, %107 : i1
    %109 = arith.extui %108 : i1 to i32
    %c0_i32_27 = arith.constant 0 : i32
    %110 = arith.cmpi ne, %109, %c0_i32_27 : i32
    scf.if %110 {
      %c0_28 = arith.constant 0 : index
      %c0_29 = arith.constant 0 : index
      %111 = vector.load %arg13[%c0_28, %c0_29] : memref<1x1xf32, #tpu.memory_space<vmem>>, vector<1x1xf32>
      %112 = math.sqrt %111 : vector<1x1xf32>
      %c0_30 = arith.constant 0 : index
      %c0_31 = arith.constant 0 : index
      %113 = vector.load %arg10[%c0_30, %c0_31] : memref<1x1xf32, #tpu.memory_space<vmem>>, vector<1x1xf32>
      tpu.vector_store %arg10[%c0_30, %c0_31], %112 {strides = array<i32>} : memref<1x1xf32, #tpu.memory_space<vmem>>, vector<1x1xf32>,
    } else {
    }
    return
  }
  func.func @transform_0(%arg0: i32, %arg1: i32) -> (i32, i32) {
    %c0_i32 = arith.constant 0 : i32
    %c0_i32_0 = arith.constant 0 : i32
    return %arg0, %c0_i32 : i32, i32
  }
  func.func @transform_1(%arg0: i32, %arg1: i32) -> (i32, i32) {
    %c0_i32 = arith.constant 0 : i32
    %c0_i32_0 = arith.constant 0 : i32
    return %arg0, %c0_i32 : i32, i32
  }
  func.func @transform_2(%arg0: i32, %arg1: i32) -> (i32, i32) {
    %c0_i32 = arith.constant 0 : i32
    %c0_i32_0 = arith.constant 0 : i32
    return %arg0, %c0_i32 : i32, i32
  }
  func.func @transform_3(%arg0: i32, %arg1: i32) -> (i32, i32) {
    %c0_i32 = arith.constant 0 : i32
    %c0_i32_0 = arith.constant 0 : i32
    return %arg0, %c0_i32 : i32, i32
  }
  func.func @transform_4(%arg0: i32, %arg1: i32) -> (i32, i32) {
    %c0_i32 = arith.constant 0 : i32
    %c0_i32_0 = arith.constant 0 : i32
    return %c0_i32, %arg1 : i32, i32
  }
  func.func @transform_5(%arg0: i32, %arg1: i32) -> (i32, i32) {
    %c0_i32 = arith.constant 0 : i32
    %c0_i32_0 = arith.constant 0 : i32
    return %c0_i32, %arg1 : i32, i32
  }
  func.func @transform_6(%arg0: i32, %arg1: i32) -> (i32, i32) {
    %c0_i32 = arith.constant 0 : i32
    %c0_i32_0 = arith.constant 0 : i32
    return %c0_i32, %arg1 : i32, i32
  }
  func.func @transform_7(%arg0: i32, %arg1: i32) -> (i32, i32) {
    %c0_i32 = arith.constant 0 : i32
    %c0_i32_0 = arith.constant 0 : i32
    return %c0_i32, %arg1 : i32, i32
  }
  func.func @transform_8(%arg0: i32, %arg1: i32) -> (i32, i32) {
    %c0_i32 = arith.constant 0 : i32
    %c0_i32_0 = arith.constant 0 : i32
    %c0_i32_1 = arith.constant 0 : i32
    return %c0_i32, %c0_i32_0 : i32, i32
  }
}

</mosaic_0001>

<bundles_post_ra>
// kernel: tpu_custom_call.1
= control target key start
LH: loop header
LB: loop body
LE: loop exit
PB: predicated region body
PF: predicated region fallthrough
CT: control target
= control target key end

     0   :  { %v1581_v3 = vmov 0   ;;  %s2793_s0 = inlined_call_operand.vmem [shape: f32[256,1], index: 0, kind: input, shape index: {}]   ;;  %s2794_s1 = inlined_call_operand.vmem [shape: f32[256,1], index: 1, kind: input, shape index: {}]   ;;  %s2795_s2 = inlined_call_operand.vmem [shape: f32[256,1], index: 2, kind: input, shape index: {}]   ;;  %s2796_s3 = inlined_call_operand.vmem [shape: f32[256,1], index: 3, kind: input, shape index: {}]   ;;  %s2797_s4 = inlined_call_operand.vmem [shape: f32[1,256], index: 4, kind: input, shape index: {}]   ;;  %s2798_s5 = inlined_call_operand.vmem [shape: f32[1,256], index: 5, kind: input, shape index: {}]   ;;  %s2799_s6 = inlined_call_operand.vmem [shape: f32[1,256], index: 6, kind: input, shape index: {}]   ;;  %s2800_s7 = inlined_call_operand.vmem [shape: f32[1,256], index: 7, kind: input, shape index: {}]   ;;  %s2801_s8 = inlined_call_operand.hbm [shape: f32[1,1], index: 8, kind: output, shape index: {}]  }
   0x1   :  { %v42_v0 = vld [vmem:[%s2793_s0 + $0x20] sm:$0xff]  ;;  %v40_v1 = vld [vmem:[%s2793_s0 + $0x10] sm:$0xff]  ;;  %1552 = vset.pattern.permute.xlu2 %v1581_v3  ;;  %1551 = vset.pattern.permute.xlu1 %v1581_v3 }
   0x2   :  { %v38_v2 = vld [vmem:[%s2793_s0] sm:$0xff]  ;;  %1550 = vset.pattern.permute.xlu0 %v1581_v3  ;;  %93 = vperm.xlu2 %1552, %v42_v0  }
   0x3   :  { %83 = vperm.xlu1 %1551, %v40_v1   ;;  %73 = vperm.xlu0 %1550, %v38_v2  }
   0x4   :  { %13 = vsyncpa [#allocation6], 0  ;;  %v43_v4 = vld [vmem:[%s2793_s0 + $0x28] sm:$0xff]  ;;  %v41_v5 = vld [vmem:[%s2793_s0 + $0x18] sm:$0xff]  ;;  %vm1496_vm0 = vcmask 1040384   ;;  %vm1397_vm6 = vcmask 7168  }
   0x5   :  { %v39_v6 = vld [vmem:[%s2793_s0 + $0x8] sm:$0xff]  ;;  %v46_v7 = vld [vmem:[%s2793_s0 + $0x40] sm:$0xff]  ;;  %v45_v8 = vld [vmem:[%s2793_s0 + $0x38] sm:$0xff]  ;;  %s1538_s20 = sshll.u32 %s2801_s8, 4  ;;  %s1539_s20 = int_to_ptr.hbm [resolvable:$true] %s1538_s20 }
   0x6   :  { %v44_v9 = vld [vmem:[%s2793_s0 + $0x30] sm:$0xff]  ;;  %v49_v10 = vld [vmem:[%s2793_s0 + $0x58] sm:$0xff]  ;;  %v47_v12 = vld [vmem:[%s2793_s0 + $0x48] sm:$0xff] }
   0x7   :  { %v48_v11 = vld [vmem:[%s2793_s0 + $0x50] sm:$0xff]  ;;  %v51_v14 = vld [vmem:[%s2793_s0 + $0x68] sm:$0xff]  ;;  %v50_v15 = vld [vmem:[%s2793_s0 + $0x60] sm:$0xff] }
   0x8   :  { %v52_v13 = vld [vmem:[%s2793_s0 + $0x70] sm:$0xff]  ;;  %v55_v16 = vld [vmem:[%s2793_s0 + $0x88] sm:$0xff]  ;;  %v54_v17 = vld [vmem:[%s2793_s0 + $0x80] sm:$0xff] }
   0x9   :  { %v53_v18 = vld [vmem:[%s2793_s0 + $0x78] sm:$0xff]  ;;  %v58_v19 = vld [vmem:[%s2793_s0 + $0xa0] sm:$0xff]  ;;  %v56_v21 = vld [vmem:[%s2793_s0 + $0x90] sm:$0xff] }
   0xa   :  { %98 = vperm.xlu2 %1552, %v43_v4   ;;  %v57_v20 = vld [vmem:[%s2793_s0 + $0x98] sm:$0xff]  ;;  %v60_v23 = vld [vmem:[%s2793_s0 + $0xb0] sm:$0xff]  ;;  %v59_v24 = vld [vmem:[%s2793_s0 + $0xa8] sm:$0xff] }
   0xb   :  { %88 = vperm.xlu1 %1551, %v41_v5   ;;  %78 = vperm.xlu0 %1550, %v39_v6   ;;  %v61_v22 = vld [vmem:[%s2793_s0 + $0xb8] sm:$0xff]  ;;  %v64_v25 = vld [vmem:[%s2793_s0 + $0xd0] sm:$0xff]  ;;  %v63_v26 = vld [vmem:[%s2793_s0 + $0xc8] sm:$0xff] }
   0xc   :  { %v62_v27 = vld [vmem:[%s2793_s0 + $0xc0] sm:$0xff]  ;;  %v67_v28 = vld [vmem:[%s2793_s0 + $0xe8] sm:$0xff]  ;;  %v65_v30 = vld [vmem:[%s2793_s0 + $0xd8] sm:$0xff] }
   0xd   :  { %v66_v29 = vld [vmem:[%s2793_s0 + $0xe0] sm:$0xff]  ;;  %v69_v32 = vld [vmem:[%s2793_s0 + $0xf8] sm:$0xff]  ;;  %v68_v33 = vld [vmem:[%s2793_s0 + $0xf0] sm:$0xff] }
   0xe   :  { %v300_v31 = vld [vmem:[%s2794_s1] sm:$0xff]  ;;  %v303_v34 = vld [vmem:[%s2794_s1 + $0x18] sm:$0xff]  ;;  %v302_v35 = vld [vmem:[%s2794_s1 + $0x10] sm:$0xff] }
   0xf   :  { %v301_v36 = vld [vmem:[%s2794_s1 + $0x8] sm:$0xff]  ;;  %v306_v38 = vld [vmem:[%s2794_s1 + $0x30] sm:$0xff]  ;;  %v304_v40 = vld [vmem:[%s2794_s1 + $0x20] sm:$0xff] }
  0x10   :  { %v305_v39 = vld [vmem:[%s2794_s1 + $0x28] sm:$0xff]  ;;  %v308_v43 = vld [vmem:[%s2794_s1 + $0x40] sm:$0xff]  ;;  %v307_v44 = vld [vmem:[%s2794_s1 + $0x38] sm:$0xff] }
  0x11   :  { %v309_v42 = vld [vmem:[%s2794_s1 + $0x48] sm:$0xff]  ;;  %v312_v46 = vld [vmem:[%s2794_s1 + $0x60] sm:$0xff]  ;;  %v311_v47 = vld [vmem:[%s2794_s1 + $0x58] sm:$0xff] }
  0x12   :  { %113 = vperm.xlu2 %1552, %v46_v7   ;;  %v310_v48 = vld [vmem:[%s2794_s1 + $0x50] sm:$0xff]  ;;  %v315_v52 = vld [vmem:[%s2794_s1 + $0x78] sm:$0xff]  ;;  %v313_v54 = vld [vmem:[%s2794_s1 + $0x68] sm:$0xff] }
  0x13   :  { %108 = vperm.xlu1 %1551, %v45_v8   ;;  %103 = vperm.xlu0 %1550, %v44_v9   ;;  %v314_v53 = vld [vmem:[%s2794_s1 + $0x70] sm:$0xff]  ;;  %v317_v59 = vld [vmem:[%s2794_s1 + $0x88] sm:$0xff]  ;;  %v316_v60 = vld [vmem:[%s2794_s1 + $0x80] sm:$0xff] }
  0x14   :  { %v318_v58 = vld [vmem:[%s2794_s1 + $0x90] sm:$0xff]  ;;  %v321_v0 = vld [vmem:[%s2794_s1 + $0xa8] sm:$0xff]  ;;  %v320_v1 = vld [vmem:[%s2794_s1 + $0xa0] sm:$0xff] }
  0x15   :  { %v319_v2 = vld [vmem:[%s2794_s1 + $0x98] sm:$0xff]  ;;  %v324_v6 = vld [vmem:[%s2794_s1 + $0xc0] sm:$0xff]  ;;  %v322_v8 = vld [vmem:[%s2794_s1 + $0xb0] sm:$0xff] }
  0x16   :  { %v323_v7 = vld [vmem:[%s2794_s1 + $0xb8] sm:$0xff] }
  0x1a   :  { %128 = vperm.xlu2 %1552, %v49_v10  }
  0x1b   :  { %123 = vperm.xlu1 %1551, %v48_v11   ;;  %118 = vperm.xlu0 %1550, %v47_v12   ;;  %v327_v12 = vld [vmem:[%s2794_s1 + $0xd8] sm:$0xff] }
  0x22   :  { %143 = vperm.xlu2 %1552, %v52_v13   ;;  %v326_v13 = vld [vmem:[%s2794_s1 + $0xd0] sm:$0xff] }
  0x23   :  { %138 = vperm.xlu1 %1551, %v51_v14   ;;  %133 = vperm.xlu0 %1550, %v50_v15   ;;  %v325_v14 = vld [vmem:[%s2794_s1 + $0xc8] sm:$0xff] }
  0x2a   :  { %158 = vperm.xlu2 %1552, %v55_v16  }
  0x2b   :  { %153 = vperm.xlu1 %1551, %v54_v17   ;;  %148 = vperm.xlu0 %1550, %v53_v18   ;;  %v330_v18 = vld [vmem:[%s2794_s1 + $0xf0] sm:$0xff] }
  0x32   :  { %173 = vperm.xlu2 %1552, %v58_v19   ;;  %v329_v19 = vld [vmem:[%s2794_s1 + $0xe8] sm:$0xff] }
  0x33   :  { %168 = vperm.xlu1 %1551, %v57_v20   ;;  %163 = vperm.xlu0 %1550, %v56_v21   ;;  %v328_v20 = vld [vmem:[%s2794_s1 + $0xe0] sm:$0xff] }
  0x3a   :  { %188 = vperm.xlu2 %1552, %v61_v22  }
  0x3b   :  { %183 = vperm.xlu1 %1551, %v60_v23   ;;  %178 = vperm.xlu0 %1550, %v59_v24   ;;  %v332_v24 = vld [vmem:[%s2798_s5] sm:$0x3] }
  0x42   :  { %203 = vperm.xlu2 %1552, %v64_v25   ;;  %v627_v25 = vld [vmem:[%s2795_s2 + $0x8] sm:$0xff] }
  0x43   :  { %198 = vperm.xlu1 %1551, %v63_v26   ;;  %193 = vperm.xlu0 %1550, %v62_v27   ;;  %v70_v26 = vld [vmem:[%s2797_s4] sm:$0x3] }
  0x44   :  { %v626_v27 = vld [vmem:[%s2795_s2] sm:$0xff] }
  0x4a   :  { %218 = vperm.xlu2 %1552, %v67_v28   ;;  %v331_v28 = vld [vmem:[%s2794_s1 + $0xf8] sm:$0xff] }
  0x4b   :  { %213 = vperm.xlu1 %1551, %v66_v29   ;;  %208 = vperm.xlu0 %1550, %v65_v30   ;;  %v1881_v29 = vperm.slane %v332_v24, 0  ;;  %v1883_v30 = vperm.slane %v332_v24, 1 }
  0x52   :  { %335 = vperm.xlu2 %1552, %v300_v31   ;;  %v1885_v31 = vperm.slane %v70_v26, 0 }
  0x53   :  { %228 = vperm.xlu1 %1551, %v69_v32   ;;  %223 = vperm.xlu0 %1550, %v68_v33   ;;  %v1887_v32 = vperm.slane %v70_v26, 1 }
  0x5a   :  { %350 = vperm.xlu2 %1552, %v303_v34  }
  0x5b   :  { %345 = vperm.xlu1 %1551, %v302_v35   ;;  %340 = vperm.xlu0 %1550, %v301_v36  }
  0x5c   :  { %v1737_v37 = vpop.permute.xlu2 %93 }
  0x62   :  { %365 = vperm.xlu2 %1552, %v306_v38  }
  0x63   :  { %360 = vperm.xlu1 %1551, %v305_v39   ;;  %355 = vperm.xlu0 %1550, %v304_v40  }
  0x64   :  { %v1748_v41 = vpop.permute.xlu2 %98 }
  0x6a   :  { %380 = vperm.xlu2 %1552, %v309_v42   ;;  %v630_v42 = vld [vmem:[%s2795_s2 + $0x20] sm:$0xff] }
  0x6b   :  { %375 = vperm.xlu1 %1551, %v308_v43   ;;  %370 = vperm.xlu0 %1550, %v307_v44  }
  0x6c   :  { %v1759_v45 = vpop.permute.xlu2 %113 }
  0x72   :  { %395 = vperm.xlu2 %1552, %v312_v46   ;;  %v629_v46 = vld [vmem:[%s2795_s2 + $0x18] sm:$0xff] }
  0x73   :  { %390 = vperm.xlu1 %1551, %v311_v47   ;;  %385 = vperm.xlu0 %1550, %v310_v48   ;;  %v628_v47 = vld [vmem:[%s2795_s2 + $0x10] sm:$0xff] }
  0x74   :  { %v1770_v49 = vpop.permute.xlu2 %128 }
  0x75   :  { %v1772_v50 = vpop.permute.xlu1 %83  ;;  %v1774_v51 = vpop.permute.xlu0 %73 }
  0x76   :  { %v236_v34 = vmul.f32 %v1885_v31, %v1774_v51  ;;  %v237_v35 = vmul.f32 %v1887_v32, %v1774_v51 }
  0x7a   :  { %410 = vperm.xlu2 %1552, %v315_v52  }
  0x7b   :  { %405 = vperm.xlu1 %1551, %v314_v53   ;;  %400 = vperm.xlu0 %1550, %v313_v54  }
  0x7c   :  { %v1785_v55 = vpop.permute.xlu2 %143 }
  0x7d   :  { %v1787_v56 = vpop.permute.xlu1 %88  ;;  %v1789_v57 = vpop.permute.xlu0 %78 }
  0x7e   :  { %v242_v51 = vmul.f32 %v1885_v31, %v1787_v56  ;;  %v243_v52 = vmul.f32 %v1887_v32, %v1787_v56  ;;  %v632_v56 = vld [vmem:[%s2795_s2 + $0x30] sm:$0xff] }
  0x82   :  { %425 = vperm.xlu2 %1552, %v318_v58  }
  0x83   :  { %420 = vperm.xlu1 %1551, %v317_v59   ;;  %415 = vperm.xlu0 %1550, %v316_v60   ;;  %v633_v60 = vld [vmem:[%s2795_s2 + $0x38] sm:$0xff] }
  0x84   :  { %v1800_v61 = vpop.permute.xlu2 %158 }
  0x85   :  { %v1802_v62 = vpop.permute.xlu1 %108  ;;  %v1804_v63 = vpop.permute.xlu0 %103 }
  0x8a   :  { %440 = vperm.xlu2 %1552, %v321_v0  }
  0x8b   :  { %435 = vperm.xlu1 %1551, %v320_v1   ;;  %430 = vperm.xlu0 %1550, %v319_v2   ;;  %v631_v2 = vld [vmem:[%s2795_s2 + $0x28] sm:$0xff] }
  0x8c   :  { %v1815_v3 = vpop.permute.xlu2 %173 }
  0x8d   :  { %v1817_v4 = vpop.permute.xlu1 %123  ;;  %v1819_v5 = vpop.permute.xlu0 %118 }
  0x92   :  { %455 = vperm.xlu2 %1552, %v324_v6  }
  0x93   :  { %450 = vperm.xlu1 %1551, %v323_v7   ;;  %445 = vperm.xlu0 %1550, %v322_v8   ;;  %v248_v7 = vmul.f32 %v1885_v31, %v1804_v63  ;;  %v249_v8 = vmul.f32 %v1887_v32, %v1804_v63  ;;  %v635_v63 = vld [vmem:[%s2795_s2 + $0x48] sm:$0xff] }
  0x94   :  { %v1830_v9 = vpop.permute.xlu2 %188 }
  0x95   :  { %v1832_v10 = vpop.permute.xlu1 %138  ;;  %v1834_v11 = vpop.permute.xlu0 %133 }
  0x9a   :  { %470 = vperm.xlu2 %1552, %v327_v12  }
  0x9b   :  { %465 = vperm.xlu1 %1551, %v326_v13   ;;  %460 = vperm.xlu0 %1550, %v325_v14  }
  0x9c   :  { %v1845_v15 = vpop.permute.xlu2 %203 }
  0x9d   :  { %v1847_v16 = vpop.permute.xlu1 %153  ;;  %v1849_v17 = vpop.permute.xlu0 %148 }
  0xa2   :  { %485 = vperm.xlu2 %1552, %v330_v18  }
  0xa3   :  { %480 = vperm.xlu1 %1551, %v329_v19   ;;  %475 = vperm.xlu0 %1550, %v328_v20   ;;  %v636_v19 = vld [vmem:[%s2795_s2 + $0x50] sm:$0xff] }
  0xa4   :  { %v1860_v21 = vpop.permute.xlu2 %218 }
  0xa5   :  { %v1862_v22 = vpop.permute.xlu1 %168  ;;  %v1864_v23 = vpop.permute.xlu0 %163 }
  0xaa   :  { %665 = vperm.xlu2 %1552, %v627_v25   ;;  %v634_v25 = vld [vmem:[%s2795_s2 + $0x40] sm:$0xff] }
  0xab   :  { %660 = vperm.xlu1 %1551, %v626_v27   ;;  %490 = vperm.xlu0 %1550, %v331_v28   ;;  %v254_v27 = vmul.f32 %v1885_v31, %v1819_v5  ;;  %v255_v28 = vmul.f32 %v1887_v32, %v1819_v5  ;;  %v638_v5 = vld [vmem:[%s2795_s2 + $0x60] sm:$0xff] }
  0xac   :  { %v336_v33 = vpop.permute.xlu2 %335 }
  0xad   :  { %v498_v36 = vmul.f32 %v1881_v29, %v336_v33  ;;  %v499_v38 = vmul.f32 %v1883_v30, %v336_v33  ;;  %v1895_v39 = vpop.permute.xlu1 %183  ;;  %v1897_v40 = vpop.permute.xlu0 %178 }
  0xaf   :  { %v1902_v43 = vadd.f32 %v498_v36, %v236_v34  ;;  %v1904_v44 = vadd.f32 %v499_v38, %v237_v35  ;;  %v639_v38 = vld [vmem:[%s2795_s2 + $0x68] sm:$0xff] }
  0xb2   :  { %680 = vperm.xlu2 %1552, %v630_v42  }
  0xb3   :  { %675 = vperm.xlu1 %1551, %v629_v46   ;;  %670 = vperm.xlu0 %1550, %v628_v47   ;;  %v637_v47 = vld [vmem:[%s2795_s2 + $0x58] sm:$0xff] }
  0xb4   :  { %v351_v48 = vpop.permute.xlu2 %350 }
  0xb5   :  { %v504_v53 = vmul.f32 %v1881_v29, %v351_v48  ;;  %v505_v54 = vmul.f32 %v1883_v30, %v351_v48  ;;  %v1918_v58 = vpop.permute.xlu1 %198  ;;  %v1920_v59 = vpop.permute.xlu0 %193  ;;  %v240_v48 = vmul.f32 %v1885_v31, %v1772_v50 }
  0xb7   :  { %v1925_v0 = vadd.f32 %v504_v53, %v242_v51  ;;  %v1927_v1 = vadd.f32 %v505_v54, %v243_v52  ;;  %v241_v51 = vmul.f32 %v1887_v32, %v1772_v50  ;;  %v238_v52 = vmul.f32 %v1885_v31, %v1789_v57 }
  0xb8   :  { %v239_v53 = vmul.f32 %v1887_v32, %v1789_v57 }
  0xba   :  { %695 = vperm.xlu2 %1552, %v633_v60   ;;  %v260_v60 = vmul.f32 %v1885_v31, %v1834_v11 }
  0xbb   :  { %690 = vperm.xlu1 %1551, %v632_v56   ;;  %685 = vperm.xlu0 %1550, %v631_v2   ;;  %v261_v56 = vmul.f32 %v1887_v32, %v1834_v11 }
  0xbc   :  { %v366_v6 = vpop.permute.xlu2 %365 }
  0xbd   :  { %v510_v12 = vmul.f32 %v1881_v29, %v366_v6  ;;  %v511_v13 = vmul.f32 %v1883_v30, %v366_v6  ;;  %v1941_v14 = vpop.permute.xlu1 %213  ;;  %v1943_v18 = vpop.permute.xlu0 %208 }
  0xbf   :  { %v1948_v20 = vadd.f32 %v510_v12, %v248_v7  ;;  %v1950_v24 = vadd.f32 %v511_v13, %v249_v8 }
  0xc2   :  { %710 = vperm.xlu2 %1552, %v636_v19   ;;  %v642_v19 = vld [vmem:[%s2795_s2 + $0x80] sm:$0xff] }
  0xc3   :  { %705 = vperm.xlu1 %1551, %v635_v63   ;;  %700 = vperm.xlu0 %1550, %v634_v25   ;;  %v641_v25 = vld [vmem:[%s2795_s2 + $0x78] sm:$0xff] }
  0xc4   :  { %v381_v26 = vpop.permute.xlu2 %380 }
  0xc5   :  { %v516_v33 = vmul.f32 %v1881_v29, %v381_v26  ;;  %v517_v34 = vmul.f32 %v1883_v30, %v381_v26  ;;  %v1964_v35 = vpop.permute.xlu1 %228  ;;  %v1966_v36 = vpop.permute.xlu0 %223  ;;  %v640_v26 = vld [vmem:[%s2795_s2 + $0x70] sm:$0xff] }
  0xc7   :  { %v1971_v42 = vadd.f32 %v516_v33, %v254_v27  ;;  %v1973_v46 = vadd.f32 %v517_v34, %v255_v28 }
  0xca   :  { %725 = vperm.xlu2 %1552, %v639_v38   ;;  %v244_v38 = vmul.f32 %v1885_v31, %v1737_v37 }
  0xcb   :  { %720 = vperm.xlu1 %1551, %v638_v5   ;;  %715 = vperm.xlu0 %1550, %v637_v47   ;;  %v245_v5 = vmul.f32 %v1887_v32, %v1737_v37  ;;  %v246_v47 = vmul.f32 %v1885_v31, %v1748_v41 }
  0xcc   :  { %v396_v54 = vpop.permute.xlu2 %395 }
  0xcd   :  { %v522_v2 = vmul.f32 %v1881_v29, %v396_v54  ;;  %v523_v6 = vmul.f32 %v1883_v30, %v396_v54  ;;  %v346_v7 = vpop.permute.xlu1 %345  ;;  %v341_v8 = vpop.permute.xlu0 %340 }
  0xce   :  { %v502_v50 = vmul.f32 %v1881_v29, %v346_v7  ;;  %v503_v12 = vmul.f32 %v1883_v30, %v346_v7  ;;  %v500_v13 = vmul.f32 %v1881_v29, %v341_v8  ;;  %v501_v57 = vmul.f32 %v1883_v30, %v341_v8  ;;  %v645_v8 = vld [vmem:[%s2795_s2 + $0x98] sm:$0xff] }
  0xcf   :  { %v2002_v63 = vadd.f32 %v522_v2, %v260_v60  ;;  %v2004_v11 = vadd.f32 %v523_v6, %v261_v56 }
  0xd0   :  { %v2012_v27 = vadd.f32 %v500_v13, %v238_v52  ;;  %v2014_v28 = vadd.f32 %v501_v57, %v239_v53  ;;  %v2016_v33 = vadd.f32 %v502_v50, %v240_v48  ;;  %v2018_v34 = vadd.f32 %v503_v12, %v241_v51  ;;  %v644_v12 = vld [vmem:[%s2795_s2 + $0x90] sm:$0xff]  ;;  %v643_v13 = vld [vmem:[%s2795_s2 + $0x88] sm:$0xff] }
  0xd1   :  { %v247_v52 = vmul.f32 %v1887_v32, %v1748_v41  ;;  %v266_v48 = vmul.f32 %v1885_v31, %v1849_v17  ;;  %v267_v51 = vmul.f32 %v1887_v32, %v1849_v17 }
  0xd2   :  { %740 = vperm.xlu2 %1552, %v642_v19  }
  0xd3   :  { %735 = vperm.xlu1 %1551, %v641_v25   ;;  %730 = vperm.xlu0 %1550, %v640_v26  }
  0xd4   :  { %v411_v53 = vpop.permute.xlu2 %410 }
  0xd5   :  { %v528_v54 = vmul.f32 %v1881_v29, %v411_v53  ;;  %v529_v60 = vmul.f32 %v1883_v30, %v411_v53  ;;  %v361_v56 = vpop.permute.xlu1 %360  ;;  %v356_v2 = vpop.permute.xlu0 %355  ;;  %v252_v53 = vmul.f32 %v1885_v31, %v1759_v45 }
  0xd6   :  { %v508_v37 = vmul.f32 %v1881_v29, %v361_v56  ;;  %v509_v6 = vmul.f32 %v1883_v30, %v361_v56  ;;  %v506_v7 = vmul.f32 %v1881_v29, %v356_v2  ;;  %v507_v41 = vmul.f32 %v1883_v30, %v356_v2 }
  0xd7   :  { %v2041_v50 = vadd.f32 %v528_v54, %v266_v48  ;;  %v2043_v17 = vadd.f32 %v529_v60, %v267_v51  ;;  %v253_v48 = vmul.f32 %v1887_v32, %v1759_v45  ;;  %v250_v51 = vmul.f32 %v1885_v31, %v1802_v62 }
  0xd8   :  { %v2051_v57 = vadd.f32 %v506_v7, %v244_v38  ;;  %v2053_v19 = vadd.f32 %v507_v41, %v245_v5  ;;  %v2055_v25 = vadd.f32 %v508_v37, %v246_v47  ;;  %v2057_v26 = vadd.f32 %v509_v6, %v247_v52  ;;  %v648_v7 = vld [vmem:[%s2795_s2 + $0xb0] sm:$0xff] }
  0xd9   :  { %2802 = vst [vmem:[#allocation8_spill] sm:$0xff] %v2041_v50  ;;  %v251_v38 = vmul.f32 %v1887_v32, %v1802_v62  ;;  %v272_v47 = vmul.f32 %v1885_v31, %v1864_v23  ;;  %v273_v52 = vmul.f32 %v1887_v32, %v1864_v23 }
  0xda   :  { %2803 = vst [vmem:[#allocation9_spill] sm:$0xff] %v2043_v17  ;;  %755 = vperm.xlu2 %1552, %v645_v8   ;;  %v647_v8 = vld [vmem:[%s2795_s2 + $0xa8] sm:$0xff] }
  0xdb   :  { %750 = vperm.xlu1 %1551, %v644_v12   ;;  %745 = vperm.xlu0 %1550, %v643_v13   ;;  %v646_v12 = vld [vmem:[%s2795_s2 + $0xa0] sm:$0xff] }
  0xdc   :  { %v426_v5 = vpop.permute.xlu2 %425 }
  0xdd   :  { %v534_v54 = vmul.f32 %v1881_v29, %v426_v5  ;;  %v535_v60 = vmul.f32 %v1883_v30, %v426_v5  ;;  %v376_v56 = vpop.permute.xlu1 %375  ;;  %v371_v2 = vpop.permute.xlu0 %370 }
  0xde   :  { %v514_v45 = vmul.f32 %v1881_v29, %v376_v56  ;;  %v515_v37 = vmul.f32 %v1883_v30, %v376_v56  ;;  %v512_v6 = vmul.f32 %v1881_v29, %v371_v2  ;;  %v513_v62 = vmul.f32 %v1883_v30, %v371_v2 }
  0xdf   :  { %v2080_v41 = vadd.f32 %v534_v54, %v272_v47  ;;  %v2082_v23 = vadd.f32 %v535_v60, %v273_v52  ;;  %v258_v47 = vmul.f32 %v1885_v31, %v1770_v49  ;;  %v259_v52 = vmul.f32 %v1887_v32, %v1770_v49 }
  0xe0   :  { %v2090_v13 = vadd.f32 %v512_v6, %v250_v51  ;;  %v2092_v5 = vadd.f32 %v513_v62, %v251_v38  ;;  %v2094_v56 = vadd.f32 %v514_v45, %v252_v53  ;;  %v2096_v2 = vadd.f32 %v515_v37, %v253_v48 }
  0xe1   :  { %2804 = vst [vmem:[#allocation10_spill] sm:$0xff] %v2080_v41  ;;  %v256_v54 = vmul.f32 %v1885_v31, %v1817_v4  ;;  %v257_v51 = vmul.f32 %v1887_v32, %v1817_v4  ;;  %v278_v53 = vmul.f32 %v1885_v31, %v1897_v40  ;;  %v279_v48 = vmul.f32 %v1887_v32, %v1897_v40 }
  0xe2   :  { %2805 = vst [vmem:[#allocation11_spill] sm:$0xff] %v2082_v23  ;;  %770 = vperm.xlu2 %1552, %v648_v7  }
  0xe3   :  { %765 = vperm.xlu1 %1551, %v647_v8   ;;  %760 = vperm.xlu0 %1550, %v646_v12   ;;  %v651_v8 = vld [vmem:[%s2795_s2 + $0xc8] sm:$0xff] }
  0xe4   :  { %v441_v38 = vpop.permute.xlu2 %440 }
  0xe5   :  { %v540_v60 = vmul.f32 %v1881_v29, %v441_v38  ;;  %v541_v45 = vmul.f32 %v1883_v30, %v441_v38  ;;  %v391_v37 = vpop.permute.xlu1 %390  ;;  %v386_v6 = vpop.permute.xlu0 %385  ;;  %v650_v38 = vld [vmem:[%s2795_s2 + $0xc0] sm:$0xff] }
  0xe6   :  { %v520_v49 = vmul.f32 %v1881_v29, %v391_v37  ;;  %v521_v62 = vmul.f32 %v1883_v30, %v391_v37  ;;  %v518_v7 = vmul.f32 %v1881_v29, %v386_v6  ;;  %v519_v4 = vmul.f32 %v1883_v30, %v386_v6  ;;  %v649_v37 = vld [vmem:[%s2795_s2 + $0xb8] sm:$0xff] }
  0xe7   :  { %v2119_v12 = vadd.f32 %v540_v60, %v278_v53  ;;  %v2121_v40 = vadd.f32 %v541_v45, %v279_v48  ;;  %v264_v53 = vmul.f32 %v1885_v31, %v1785_v55  ;;  %v265_v48 = vmul.f32 %v1887_v32, %v1785_v55 }
  0xe8   :  { %v2129_v23 = vadd.f32 %v518_v7, %v256_v54  ;;  %v2131_v41 = vadd.f32 %v519_v4, %v257_v51  ;;  %v2133_v6 = vadd.f32 %v520_v49, %v258_v47  ;;  %v2135_v17 = vadd.f32 %v521_v62, %v259_v52 }
  0xe9   :  { %2806 = vst [vmem:[#allocation12_spill] sm:$0xff] %v2119_v12  ;;  %v262_v60 = vmul.f32 %v1885_v31, %v1832_v10  ;;  %v263_v54 = vmul.f32 %v1887_v32, %v1832_v10  ;;  %v284_v47 = vmul.f32 %v1885_v31, %v1920_v59  ;;  %v285_v52 = vmul.f32 %v1887_v32, %v1920_v59 }
  0xea   :  { %2807 = vst [vmem:[#allocation13_spill] sm:$0xff] %v2121_v40  ;;  %785 = vperm.xlu2 %1552, %v651_v8  }
  0xeb   :  { %780 = vperm.xlu1 %1551, %v650_v38   ;;  %775 = vperm.xlu0 %1550, %v649_v37   ;;  %v654_v38 = vld [vmem:[%s2795_s2 + $0xe0] sm:$0xff] }
  0xec   :  { %v456_v51 = vpop.permute.xlu2 %455 }
  0xed   :  { %v546_v45 = vmul.f32 %v1881_v29, %v456_v51  ;;  %v547_v49 = vmul.f32 %v1883_v30, %v456_v51  ;;  %v406_v62 = vpop.permute.xlu1 %405  ;;  %v401_v7 = vpop.permute.xlu0 %400  ;;  %v653_v51 = vld [vmem:[%s2795_s2 + $0xd8] sm:$0xff] }
  0xee   :  { %v526_v55 = vmul.f32 %v1881_v29, %v406_v62  ;;  %v527_v4 = vmul.f32 %v1883_v30, %v406_v62  ;;  %v524_v8 = vmul.f32 %v1881_v29, %v401_v7  ;;  %v525_v10 = vmul.f32 %v1883_v30, %v401_v7  ;;  %v652_v62 = vld [vmem:[%s2795_s2 + $0xd0] sm:$0xff] }
  0xef   :  { %v2158_v37 = vadd.f32 %v546_v45, %v284_v47  ;;  %v2160_v59 = vadd.f32 %v547_v49, %v285_v52  ;;  %v270_v47 = vmul.f32 %v1885_v31, %v1800_v61  ;;  %v271_v52 = vmul.f32 %v1887_v32, %v1800_v61 }
  0xf0   :  { %v2168_v40 = vadd.f32 %v524_v8, %v262_v60  ;;  %v2170_v12 = vadd.f32 %v525_v10, %v263_v54  ;;  %v2172_v7 = vadd.f32 %v526_v55, %v264_v53  ;;  %v2174_v50 = vadd.f32 %v527_v4, %v265_v48 }
  0xf1   :  { %2808 = vst [vmem:[#allocation14_spill] sm:$0xff] %v2158_v37  ;;  %v268_v45 = vmul.f32 %v1885_v31, %v1847_v16  ;;  %v269_v60 = vmul.f32 %v1887_v32, %v1847_v16  ;;  %v290_v53 = vmul.f32 %v1885_v31, %v1943_v18  ;;  %v291_v48 = vmul.f32 %v1887_v32, %v1943_v18 }
  0xf2   :  { %2809 = vst [vmem:[#allocation15_spill] sm:$0xff] %v2160_v59  ;;  %800 = vperm.xlu2 %1552, %v654_v38  }
  0xf3   :  { %2810 = vst [vmem:[#allocation16_spill] sm:$0xff] %v2174_v50  ;;  %795 = vperm.xlu1 %1551, %v653_v51   ;;  %790 = vperm.xlu0 %1550, %v652_v62   ;;  %v657_v51 = vld [vmem:[%s2795_s2 + $0xf8] sm:$0xff] }
  0xf4   :  { %v471_v54 = vpop.permute.xlu2 %470 }
  0xf5   :  { %v552_v49 = vmul.f32 %v1881_v29, %v471_v54  ;;  %v553_v55 = vmul.f32 %v1883_v30, %v471_v54  ;;  %v421_v4 = vpop.permute.xlu1 %420  ;;  %v416_v8 = vpop.permute.xlu0 %415  ;;  %v656_v54 = vld [vmem:[%s2795_s2 + $0xf0] sm:$0xff] }
  0xf6   :  { %v532_v61 = vmul.f32 %v1881_v29, %v421_v4  ;;  %v533_v10 = vmul.f32 %v1883_v30, %v421_v4  ;;  %v530_v38 = vmul.f32 %v1881_v29, %v416_v8  ;;  %v531_v16 = vmul.f32 %v1883_v30, %v416_v8  ;;  %v655_v4 = vld [vmem:[%s2795_s2 + $0xe8] sm:$0xff] }
  0xf7   :  { %v2197_v62 = vadd.f32 %v552_v49, %v290_v53  ;;  %v2199_v18 = vadd.f32 %v553_v55, %v291_v48  ;;  %v276_v53 = vmul.f32 %v1885_v31, %v1815_v3  ;;  %v277_v48 = vmul.f32 %v1887_v32, %v1815_v3 }
  0xf8   :  { %v2207_v59 = vadd.f32 %v530_v38, %v268_v45  ;;  %v2209_v37 = vadd.f32 %v531_v16, %v269_v60  ;;  %v2211_v8 = vadd.f32 %v532_v61, %v270_v47  ;;  %v2213_v50 = vadd.f32 %v533_v10, %v271_v52 }
  0xf9   :  { %2811 = vst [vmem:[#allocation17_spill] sm:$0xff] %v2197_v62  ;;  %v274_v49 = vmul.f32 %v1885_v31, %v1862_v22  ;;  %v275_v45 = vmul.f32 %v1887_v32, %v1862_v22  ;;  %v296_v47 = vmul.f32 %v1885_v31, %v1966_v36  ;;  %v297_v52 = vmul.f32 %v1887_v32, %v1966_v36  ;;  %v882_v36 = vld [vmem:[%s2799_s6] sm:$0x3] }
  0xfa   :  { %2812 = vst [vmem:[#allocation18_spill] sm:$0xff] %v2199_v18  ;;  %815 = vperm.xlu2 %1552, %v657_v51  }
  0xfb   :  { %2813 = vst [vmem:[#allocation19_spill] sm:$0xff] %v2211_v8  ;;  %810 = vperm.xlu1 %1551, %v656_v54   ;;  %805 = vperm.xlu0 %1550, %v655_v4   ;;  %v2250_v8 = vperm.slane %v882_v36, 1 }
  0xfc   :  { %2814 = vst [vmem:[#allocation20_spill] sm:$0xff] %v2213_v50  ;;  %v486_v60 = vpop.permute.xlu2 %485 }
  0xfd   :  { %v558_v55 = vmul.f32 %v1881_v29, %v486_v60  ;;  %v559_v61 = vmul.f32 %v1883_v30, %v486_v60  ;;  %v436_v10 = vpop.permute.xlu1 %435  ;;  %v431_v38 = vpop.permute.xlu0 %430 }
  0xfe   :  { %v538_v3 = vmul.f32 %v1881_v29, %v436_v10  ;;  %v539_v16 = vmul.f32 %v1883_v30, %v436_v10  ;;  %v536_v51 = vmul.f32 %v1881_v29, %v431_v38  ;;  %v537_v22 = vmul.f32 %v1883_v30, %v431_v38 }
  0xff   :  { %v2233_v54 = vadd.f32 %v558_v55, %v296_v47  ;;  %v2235_v4 = vadd.f32 %v559_v61, %v297_v52  ;;  %v2248_v10 = vperm.slane %v882_v36, 0  ;;  %v282_v47 = vmul.f32 %v1885_v31, %v1830_v9 }
 0x100   :  { %v2240_v18 = vadd.f32 %v536_v51, %v274_v49  ;;  %v2242_v60 = vadd.f32 %v537_v22, %v275_v45  ;;  %v2244_v62 = vadd.f32 %v538_v3, %v276_v53  ;;  %v2246_v50 = vadd.f32 %v539_v16, %v277_v48 }
 0x101   :  { %2815 = vst [vmem:[#allocation21_spill] sm:$0xff] %v2233_v54  ;;  %v283_v52 = vmul.f32 %v1887_v32, %v1830_v9  ;;  %v280_v49 = vmul.f32 %v1885_v31, %v1895_v39  ;;  %v281_v53 = vmul.f32 %v1887_v32, %v1895_v39 }
 0x102   :  { %2816 = vst [vmem:[#allocation22_spill] sm:$0xff] %v2235_v4 }
 0x104   :  { %v666_v55 = vpop.permute.xlu2 %665 }
 0x105   :  { %v820_v48 = vadd.f32 %v666_v55, %v2012_v27  ;;  %v821_v45 = vadd.f32 %v666_v55, %v2014_v28  ;;  %v451_v61 = vpop.permute.xlu1 %450  ;;  %v446_v38 = vpop.permute.xlu0 %445 }
 0x106   :  { %v544_v3 = vmul.f32 %v1881_v29, %v451_v61  ;;  %v545_v16 = vmul.f32 %v1883_v30, %v451_v61  ;;  %v542_v51 = vmul.f32 %v1881_v29, %v446_v38  ;;  %v543_v9 = vmul.f32 %v1883_v30, %v446_v38 }
 0x107   :  { %v2267_v22 = vadd.f32 %v2248_v10, %v820_v48  ;;  %v2270_v36 = vadd.f32 %v2250_v8, %v821_v45  ;;  %v288_v38 = vmul.f32 %v1885_v31, %v1845_v15  ;;  %v289_v48 = vmul.f32 %v1887_v32, %v1845_v15 }
 0x108   :  { %v2272_v39 = vadd.f32 %v542_v51, %v280_v49  ;;  %v2274_v27 = vadd.f32 %v543_v9, %v281_v53  ;;  %v2276_v28 = vadd.f32 %v544_v3, %v282_v47  ;;  %v2278_v55 = vadd.f32 %v545_v16, %v283_v52 }
 0x109   :  { %v286_v49 = vmul.f32 %v1885_v31, %v1918_v58  ;;  %v287_v53 = vmul.f32 %v1887_v32, %v1918_v58 }
 0x10a   :  { %2817 = vst [vmem:[#allocation23_spill] sm:$0xff] %v2278_v55 }
 0x10c   :  { %v681_v4 = vpop.permute.xlu2 %680 }
 0x10d   :  { %v826_v47 = vadd.f32 %v681_v4, %v2051_v57  ;;  %v827_v52 = vadd.f32 %v681_v4, %v2053_v19  ;;  %v466_v45 = vpop.permute.xlu1 %465  ;;  %v461_v3 = vpop.permute.xlu0 %460 }
 0x10e   :  { %v550_v16 = vmul.f32 %v1881_v29, %v466_v45  ;;  %v551_v51 = vmul.f32 %v1883_v30, %v466_v45  ;;  %v548_v9 = vmul.f32 %v1881_v29, %v461_v3  ;;  %v549_v15 = vmul.f32 %v1883_v30, %v461_v3 }
 0x10f   :  { %v2297_v61 = vadd.f32 %v2248_v10, %v826_v47  ;;  %v2300_v54 = vadd.f32 %v2250_v8, %v827_v52  ;;  %v294_v3 = vmul.f32 %v1885_v31, %v1860_v21  ;;  %v295_v47 = vmul.f32 %v1887_v32, %v1860_v21 }
 0x110   :  { %v2302_v58 = vadd.f32 %v548_v9, %v286_v49  ;;  %v2304_v57 = vadd.f32 %v549_v15, %v287_v53  ;;  %v2306_v19 = vadd.f32 %v550_v16, %v288_v38  ;;  %v2308_v4 = vadd.f32 %v551_v51, %v289_v48 }
 0x111   :  { %v292_v49 = vmul.f32 %v1885_v31, %v1941_v14  ;;  %v293_v53 = vmul.f32 %v1887_v32, %v1941_v14 }
 0x112   :  { %2818 = vst [vmem:[#allocation24_spill] sm:$0xff] %v2306_v19 }
 0x113   :  { %2819 = vst [vmem:[#allocation25_spill] sm:$0xff] %v2308_v4 }
 0x114   :  { %v696_v55 = vpop.permute.xlu2 %695 }
 0x115   :  { %v832_v38 = vadd.f32 %v696_v55, %v2090_v13  ;;  %v833_v48 = vadd.f32 %v696_v55, %v2092_v5  ;;  %v481_v52 = vpop.permute.xlu1 %480  ;;  %v476_v16 = vpop.permute.xlu0 %475 }
 0x116   :  { %v556_v51 = vmul.f32 %v1881_v29, %v481_v52  ;;  %v557_v9 = vmul.f32 %v1883_v30, %v481_v52  ;;  %v554_v15 = vmul.f32 %v1881_v29, %v476_v16  ;;  %v555_v21 = vmul.f32 %v1883_v30, %v476_v16 }
 0x117   :  { %v2327_v45 = vadd.f32 %v2248_v10, %v832_v38  ;;  %v2330_v4 = vadd.f32 %v2250_v8, %v833_v48  ;;  %v298_v16 = vmul.f32 %v1885_v31, %v1964_v35  ;;  %v299_v38 = vmul.f32 %v1887_v32, %v1964_v35 }
 0x118   :  { %v2332_v14 = vadd.f32 %v554_v15, %v292_v49  ;;  %v2334_v13 = vadd.f32 %v555_v21, %v293_v53  ;;  %v2336_v5 = vadd.f32 %v556_v51, %v294_v3  ;;  %v2338_v55 = vadd.f32 %v557_v9, %v295_v47 }
 0x119   :  { %v959_v52 = vmin.f32 %v2327_v45, %v2330_v4 }
 0x11c   :  { %v711_v19 = vpop.permute.xlu2 %710 }
 0x11d   :  { %v838_v48 = vadd.f32 %v711_v19, %v2129_v23  ;;  %v839_v49 = vadd.f32 %v711_v19, %v2131_v41  ;;  %v661_v53 = vpop.permute.xlu1 %660  ;;  %v491_v15 = vpop.permute.xlu0 %490 }
 0x11e   :  { %v818_v3 = vadd.f32 %v661_v53, %v1902_v43  ;;  %v819_v47 = vadd.f32 %v661_v53, %v1904_v44  ;;  %v560_v51 = vmul.f32 %v1881_v29, %v491_v15  ;;  %v561_v9 = vmul.f32 %v1883_v30, %v491_v15 }
 0x11f   :  { %v2353_v21 = vadd.f32 %v2248_v10, %v838_v48  ;;  %v2356_v31 = vadd.f32 %v2250_v8, %v839_v49 }
 0x120   :  { %v888_v32 = vadd.f32 %v2248_v10, %v818_v3  ;;  %v889_v35 = vadd.f32 %v2250_v8, %v819_v47  ;;  %v2360_v41 = vadd.f32 %v560_v51, %v298_v16  ;;  %v2362_v23 = vadd.f32 %v561_v9, %v299_v38 }
 0x121   :  { %v962_v43 = vmin.f32 %v2353_v21, %v2356_v31  ;;  %v2820_v16 = vmin.f32 %v2267_v22, %v2270_v36 }
 0x122   :  { %v952_v29 = vmin.f32 %v888_v32, %v889_v35  ;;  %v1119_v30 = vmin.f32 %v888_v32, %v2267_v22  ;;  %v1120_v44 = vmin.f32 %v889_v35, %v2270_v36 }
 0x124   :  { %v726_v19 = vpop.permute.xlu2 %725 }
 0x125   :  { %v844_v48 = vadd.f32 %v726_v19, %v2168_v40  ;;  %v845_v49 = vadd.f32 %v726_v19, %v2170_v12  ;;  %v676_v53 = vpop.permute.xlu1 %675  ;;  %1237 = vmin.xlane.f32.xlu0 %v952_v29  ;;  %1239 = vmin.xlane.f32.xlu1 %v2820_v16  ;;  %v671_v38 = vpop.permute.xlu0 %670 }
 0x126   :  { %v824_v15 = vadd.f32 %v676_v53, %v1925_v0  ;;  %v825_v3 = vadd.f32 %v676_v53, %v1927_v1  ;;  %v822_v47 = vadd.f32 %v671_v38, %v2016_v33  ;;  %v823_v51 = vadd.f32 %v671_v38, %v2018_v34 }
 0x127   :  { %v2378_v9 = vadd.f32 %v2248_v10, %v844_v48  ;;  %v2381_v12 = vadd.f32 %v2250_v8, %v845_v49  ;;  %v2821_v38 = vmin.f32 %v2297_v61, %v2300_v54 }
 0x128   :  { %v892_v40 = vadd.f32 %v2248_v10, %v822_v47  ;;  %v893_v22 = vadd.f32 %v2250_v8, %v823_v51  ;;  %v894_v36 = vadd.f32 %v2248_v10, %v824_v15  ;;  %v895_v0 = vadd.f32 %v2250_v8, %v825_v3 }
 0x129   :  { %v965_v1 = vmin.f32 %v2378_v9, %v2381_v12 }
 0x12a   :  { %v954_v33 = vmin.f32 %v892_v40, %v893_v22  ;;  %v1121_v32 = vmin.f32 %v1119_v30, %v892_v40  ;;  %v1122_v34 = vmin.f32 %v1120_v44, %v893_v22  ;;  %v955_v35 = vmin.f32 %v894_v36, %v895_v0 }
 0x12c   :  { %1241 = vmin.xlane.f32.xlu2 %v954_v33  ;;  %v741_v29 = vpop.permute.xlu2 %740  ;;  %v1123_v19 = vmin.f32 %v1121_v32, %v894_v36  ;;  %v1124_v48 = vmin.f32 %v1122_v34, %v895_v0 }
 0x12d   :  { %v850_v49 = vadd.f32 %v741_v29, %v2207_v59  ;;  %v851_v53 = vadd.f32 %v741_v29, %v2209_v37  ;;  %v691_v16 = vpop.permute.xlu1 %690  ;;  %1245 = vmin.xlane.f32.xlu0 %v2821_v38  ;;  %v686_v15 = vpop.permute.xlu0 %685 }
 0x12e   :  { %v830_v3 = vadd.f32 %v691_v16, %v1948_v20  ;;  %v831_v30 = vadd.f32 %v691_v16, %v1950_v24  ;;  %v828_v44 = vadd.f32 %v686_v15, %v2055_v25  ;;  %v829_v47 = vadd.f32 %v686_v15, %v2057_v26 }
 0x12f   :  { %v1125_v51 = vmin.f32 %v1123_v19, %v2297_v61  ;;  %v1126_v59 = vmin.f32 %v1124_v48, %v2300_v54  ;;  %v2401_v37 = vadd.f32 %v2248_v10, %v850_v49  ;;  %v2404_v40 = vadd.f32 %v2250_v8, %v851_v53 }
 0x130   :  { %v898_v22 = vadd.f32 %v2248_v10, %v828_v44  ;;  %v899_v20 = vadd.f32 %v2250_v8, %v829_v47  ;;  %v900_v24 = vadd.f32 %v2248_v10, %v830_v3  ;;  %v901_v25 = vadd.f32 %v2250_v8, %v831_v30 }
 0x131   :  { %v968_v26 = vmin.f32 %v2401_v37, %v2404_v40 }
 0x132   :  { %v957_v61 = vmin.f32 %v898_v22, %v899_v20  ;;  %v1127_v36 = vmin.f32 %v1125_v51, %v898_v22  ;;  %v1128_v54 = vmin.f32 %v1126_v59, %v899_v20  ;;  %v958_v0 = vmin.f32 %v900_v24, %v901_v25 }
 0x134   :  { %1243 = vmin.xlane.f32.xlu2 %v955_v35  ;;  %1247 = vmin.xlane.f32.xlu1 %v957_v61  ;;  %v756_v33 = vpop.permute.xlu2 %755  ;;  %v1129_v32 = vmin.f32 %v1127_v36, %v900_v24  ;;  %v1130_v34 = vmin.f32 %v1128_v54, %v901_v25 }
 0x135   :  { %v856_v29 = vadd.f32 %v756_v33, %v2240_v18  ;;  %v857_v19 = vadd.f32 %v756_v33, %v2242_v60  ;;  %v706_v48 = vpop.permute.xlu1 %705  ;;  %1251 = vmin.xlane.f32.xlu0 %v959_v52  ;;  %v701_v49 = vpop.permute.xlu0 %700 }
 0x136   :  { %v836_v53 = vadd.f32 %v706_v48, %v1971_v42  ;;  %v837_v16 = vadd.f32 %v706_v48, %v1973_v46  ;;  %v834_v35 = vadd.f32 %v701_v49, %v2094_v56  ;;  %v835_v38 = vadd.f32 %v701_v49, %v2096_v2 }
 0x137   :  { %v1131_v15 = vmin.f32 %v1129_v32, %v2327_v45  ;;  %v1132_v18 = vmin.f32 %v1130_v34, %v2330_v4  ;;  %v2424_v60 = vadd.f32 %v2248_v10, %v856_v29  ;;  %v2427_v3 = vadd.f32 %v2250_v8, %v857_v19 }
 0x138   :  { %v904_v52 = vadd.f32 %v2248_v10, %v834_v35  ;;  %v905_v42 = vadd.f32 %v2250_v8, %v835_v38  ;;  %v906_v46 = vadd.f32 %v2248_v10, %v836_v53  ;;  %v907_v56 = vadd.f32 %v2250_v8, %v837_v16 }
 0x139   :  { %v971_v2 = vmin.f32 %v2424_v60, %v2427_v3 }
 0x13a   :  { %v960_v45 = vmin.f32 %v904_v52, %v905_v42  ;;  %v1133_v30 = vmin.f32 %v1131_v15, %v904_v52  ;;  %v1134_v4 = vmin.f32 %v1132_v18, %v905_v42  ;;  %v961_v44 = vmin.f32 %v906_v46, %v907_v56  ;;  %v2822_v15 = vld [vmem:[#allocation8_spill] sm:$0xff]  ;;  %v2823_v52 = vld [vmem:[#allocation9_spill] sm:$0xff] }
 0x13c   :  { %1249 = vmin.xlane.f32.xlu2 %v958_v0  ;;  %1253 = vmin.xlane.f32.xlu1 %v960_v45  ;;  %v771_v47 = vpop.permute.xlu2 %770  ;;  %v1135_v51 = vmin.f32 %v1133_v30, %v906_v46  ;;  %v1136_v59 = vmin.f32 %v1134_v4, %v907_v56  ;;  %v2824_v56 = vld [vmem:[#allocation16_spill] sm:$0xff] }
 0x13d   :  { %v862_v22 = vadd.f32 %v771_v47, %v2272_v39  ;;  %v863_v20 = vadd.f32 %v771_v47, %v2274_v27  ;;  %v721_v24 = vpop.permute.xlu1 %720  ;;  %1257 = vmin.xlane.f32.xlu0 %v962_v43  ;;  %v716_v25 = vpop.permute.xlu0 %715 }
 0x13e   :  { %v842_v61 = vadd.f32 %v721_v24, %v2002_v63  ;;  %v843_v36 = vadd.f32 %v721_v24, %v2004_v11  ;;  %v840_v54 = vadd.f32 %v716_v25, %v2133_v6  ;;  %v841_v0 = vadd.f32 %v716_v25, %v2135_v17 }
 0x13f   :  { %v1137_v33 = vmin.f32 %v1135_v51, %v2353_v21  ;;  %v1138_v39 = vmin.f32 %v1136_v59, %v2356_v31  ;;  %v2447_v27 = vadd.f32 %v2248_v10, %v862_v22  ;;  %v2450_v32 = vadd.f32 %v2250_v8, %v863_v20 }
 0x140   :  { %v910_v43 = vadd.f32 %v2248_v10, %v840_v54  ;;  %v911_v63 = vadd.f32 %v2250_v8, %v841_v0  ;;  %v912_v11 = vadd.f32 %v2248_v10, %v842_v61  ;;  %v913_v6 = vadd.f32 %v2250_v8, %v843_v36 }
 0x141   :  { %v974_v17 = vmin.f32 %v2447_v27, %v2450_v32 }
 0x142   :  { %v963_v21 = vmin.f32 %v910_v43, %v911_v63  ;;  %v1139_v34 = vmin.f32 %v1137_v33, %v910_v43  ;;  %v1140_v31 = vmin.f32 %v1138_v39, %v911_v63  ;;  %v964_v29 = vmin.f32 %v912_v11, %v913_v6  ;;  %v2825_v33 = vld [vmem:[#allocation10_spill] sm:$0xff]  ;;  %v2826_v43 = vld [vmem:[#allocation11_spill] sm:$0xff] }
 0x144   :  { %1255 = vmin.xlane.f32.xlu2 %v961_v44  ;;  %1259 = vmin.xlane.f32.xlu1 %v963_v21  ;;  %v786_v19 = vpop.permute.xlu2 %785  ;;  %v1141_v48 = vmin.f32 %v1139_v34, %v912_v11  ;;  %v1142_v49 = vmin.f32 %v1140_v31, %v913_v6  ;;  %v2827_v11 = vld [vmem:[#allocation19_spill] sm:$0xff]  ;;  %v2828_v21 = vld [vmem:[#allocation20_spill] sm:$0xff] }
 0x145   :  { %v868_v53 = vadd.f32 %v786_v19, %v2302_v58  ;;  %v869_v16 = vadd.f32 %v786_v19, %v2304_v57  ;;  %v736_v35 = vpop.permute.xlu1 %735  ;;  %1263 = vmin.xlane.f32.xlu0 %v965_v1  ;;  %v731_v38 = vpop.permute.xlu0 %730 }
 0x146   :  { %v848_v18 = vadd.f32 %v736_v35, %v2822_v15  ;;  %v849_v42 = vadd.f32 %v736_v35, %v2823_v52  ;;  %v846_v46 = vadd.f32 %v731_v38, %v2172_v7  ;;  %v847_v45 = vadd.f32 %v731_v38, %v2824_v56 }
 0x147   :  { %v1143_v30 = vmin.f32 %v1141_v48, %v2378_v9  ;;  %v1144_v58 = vmin.f32 %v1142_v49, %v2381_v12  ;;  %v2470_v57 = vadd.f32 %v2248_v10, %v868_v53  ;;  %v2473_v4 = vadd.f32 %v2250_v8, %v869_v16 }
 0x148   :  { %v916_v1 = vadd.f32 %v2248_v10, %v846_v46  ;;  %v917_v44 = vadd.f32 %v2250_v8, %v847_v45  ;;  %v918_v47 = vadd.f32 %v2248_v10, %v848_v18  ;;  %v919_v7 = vadd.f32 %v2250_v8, %v849_v42  ;;  %v2829_v45 = vld [vmem:[#allocation12_spill] sm:$0xff] }
 0x149   :  { %v977_v51 = vmin.f32 %v2470_v57, %v2473_v4 }
 0x14a   :  { %v966_v9 = vmin.f32 %v916_v1, %v917_v44  ;;  %v1145_v59 = vmin.f32 %v1143_v30, %v916_v1  ;;  %v1146_v12 = vmin.f32 %v1144_v58, %v917_v44  ;;  %v967_v22 = vmin.f32 %v918_v47, %v919_v7  ;;  %v2830_v58 = vld [vmem:[#allocation13_spill] sm:$0xff] }
 0x14c   :  { %1261 = vmin.xlane.f32.xlu2 %v964_v29  ;;  %1265 = vmin.xlane.f32.xlu1 %v966_v9  ;;  %v801_v20 = vpop.permute.xlu2 %800  ;;  %v1147_v24 = vmin.f32 %v1145_v59, %v918_v47  ;;  %v1148_v25 = vmin.f32 %v1146_v12, %v919_v7 }
 0x14d   :  { %v874_v61 = vadd.f32 %v801_v20, %v2332_v14  ;;  %v875_v36 = vadd.f32 %v801_v20, %v2334_v13  ;;  %v751_v54 = vpop.permute.xlu1 %750  ;;  %1269 = vmin.xlane.f32.xlu0 %v968_v26  ;;  %v746_v0 = vpop.permute.xlu0 %745 }
 0x14e   :  { %v854_v39 = vadd.f32 %v751_v54, %v2825_v33  ;;  %v855_v63 = vadd.f32 %v751_v54, %v2826_v43  ;;  %v852_v6 = vadd.f32 %v746_v0, %v2827_v11  ;;  %v853_v34 = vadd.f32 %v746_v0, %v2828_v21  ;;  %v2831_v54 = vld [vmem:[#allocation14_spill] sm:$0xff]  ;;  %v2832_v33 = vld [vmem:[#allocation15_spill] sm:$0xff] }
 0x14f   :  { %v1149_v31 = vmin.f32 %v1147_v24, %v2401_v37  ;;  %v1150_v14 = vmin.f32 %v1148_v25, %v2404_v40  ;;  %v2493_v13 = vadd.f32 %v2248_v10, %v874_v61  ;;  %v2496_v29 = vadd.f32 %v2250_v8, %v875_v36 }
 0x150   :  { %v922_v26 = vadd.f32 %v2248_v10, %v852_v6  ;;  %v923_v19 = vadd.f32 %v2250_v8, %v853_v34  ;;  %v924_v48 = vadd.f32 %v2248_v10, %v854_v39  ;;  %v925_v49 = vadd.f32 %v2250_v8, %v855_v63  ;;  %v2833_v63 = vld [vmem:[#allocation23_spill] sm:$0xff] }
 0x151   :  { %v980_v53 = vmin.f32 %v2493_v13, %v2496_v29 }
 0x152   :  { %v969_v37 = vmin.f32 %v922_v26, %v923_v19  ;;  %v1151_v16 = vmin.f32 %v1149_v31, %v922_v26  ;;  %v1152_v40 = vmin.f32 %v1150_v14, %v923_v19  ;;  %v970_v35 = vmin.f32 %v924_v48, %v925_v49 }
 0x154   :  { %1267 = vmin.xlane.f32.xlu2 %v967_v22  ;;  %1271 = vmin.xlane.f32.xlu1 %v969_v37  ;;  %v816_v38 = vpop.permute.xlu2 %815  ;;  %v1153_v15 = vmin.f32 %v1151_v16, %v924_v48  ;;  %v1154_v18 = vmin.f32 %v1152_v40, %v925_v49 }
 0x155   :  { %v880_v52 = vadd.f32 %v816_v38, %v2360_v41  ;;  %v881_v42 = vadd.f32 %v816_v38, %v2362_v23  ;;  %v766_v46 = vpop.permute.xlu1 %765  ;;  %1275 = vmin.xlane.f32.xlu0 %v971_v2  ;;  %v761_v56 = vpop.permute.xlu0 %760 }
 0x156   :  { %v860_v30 = vadd.f32 %v766_v46, %v2829_v45  ;;  %v861_v1 = vadd.f32 %v766_v46, %v2830_v58  ;;  %v858_v44 = vadd.f32 %v761_v56, %v2244_v62  ;;  %v859_v47 = vadd.f32 %v761_v56, %v2246_v50 }
 0x157   :  { %v1155_v7 = vmin.f32 %v1153_v15, %v2424_v60  ;;  %v1156_v41 = vmin.f32 %v1154_v18, %v2427_v3  ;;  %v2516_v23 = vadd.f32 %v2248_v10, %v880_v52  ;;  %v2519_v9 = vadd.f32 %v2250_v8, %v881_v42  ;;  %v2836_v15 = vld [vmem:[#allocation24_spill] sm:$0xff]  ;;  %v2837_v52 = vld [vmem:[#allocation25_spill] sm:$0xff] }
 0x158   :  { %v928_v2 = vadd.f32 %v2248_v10, %v858_v44  ;;  %v929_v59 = vadd.f32 %v2250_v8, %v859_v47  ;;  %v930_v12 = vadd.f32 %v2248_v10, %v860_v30  ;;  %v931_v62 = vadd.f32 %v2250_v8, %v861_v1 }
 0x159   :  { %v983_v50 = vmin.f32 %v2516_v23, %v2519_v9 }
 0x15a   :  { %v972_v60 = vmin.f32 %v928_v2, %v929_v59  ;;  %v1157_v22 = vmin.f32 %v1155_v7, %v928_v2  ;;  %v1158_v3 = vmin.f32 %v1156_v41, %v929_v59  ;;  %v973_v20 = vmin.f32 %v930_v12, %v931_v62 }
 0x15c   :  { %1273 = vmin.xlane.f32.xlu2 %v970_v35  ;;  %1277 = vmin.xlane.f32.xlu1 %v972_v60  ;;  %v1159_v24 = vmin.f32 %v1157_v22, %v930_v12  ;;  %v1160_v25 = vmin.f32 %v1158_v3, %v931_v62  ;;  %v2835_v35 = vld [vmem:[#allocation18_spill] sm:$0xff] }
 0x15d   :  { %v781_v61 = vpop.permute.xlu1 %780  ;;  %1281 = vmin.xlane.f32.xlu0 %v974_v17  ;;  %v776_v36 = vpop.permute.xlu0 %775  ;;  %v2839_v62 = vld [vmem:[#allocation22_spill] sm:$0xff] }
 0x15e   :  { %v866_v0 = vadd.f32 %v781_v61, %v2831_v54  ;;  %v867_v39 = vadd.f32 %v781_v61, %v2832_v33  ;;  %v864_v43 = vadd.f32 %v776_v36, %v2276_v28  ;;  %v865_v11 = vadd.f32 %v776_v36, %v2833_v63 }
 0x15f   :  { %v1161_v6 = vmin.f32 %v1159_v24, %v2447_v27  ;;  %v1162_v21 = vmin.f32 %v1160_v25, %v2450_v32  ;;  %v2834_v32 = vld [vmem:[#allocation17_spill] sm:$0xff] }
 0x160   :  { %v934_v34 = vadd.f32 %v2248_v10, %v864_v43  ;;  %v935_v31 = vadd.f32 %v2250_v8, %v865_v11  ;;  %v936_v14 = vadd.f32 %v2248_v10, %v866_v0  ;;  %v937_v17 = vadd.f32 %v2250_v8, %v867_v39 }
 0x162   :  { %v975_v26 = vmin.f32 %v934_v34, %v935_v31  ;;  %v1163_v19 = vmin.f32 %v1161_v6, %v934_v34  ;;  %v1164_v48 = vmin.f32 %v1162_v21, %v935_v31  ;;  %v976_v49 = vmin.f32 %v936_v14, %v937_v17 }
 0x164   :  { %1279 = vmin.xlane.f32.xlu2 %v973_v20  ;;  %1283 = vmin.xlane.f32.xlu1 %v975_v26  ;;  %v1165_v28 = vmin.f32 %v1163_v19, %v936_v14  ;;  %v1166_v37 = vmin.f32 %v1164_v48, %v937_v17  ;;  %v1491_v17 = vld [vmem:[%s2800_s7] sm:$0x3] }
 0x165   :  { %v796_v16 = vpop.permute.xlu1 %795  ;;  %1287 = vmin.xlane.f32.xlu0 %v977_v51  ;;  %v791_v27 = vpop.permute.xlu0 %790  ;;  %vm1492_vm1 = vcmp.gt.f32.partialorder %v1491_v17, 0.0 }
 0x166   :  { %v872_v40 = vadd.f32 %v796_v16, %v2834_v32  ;;  %v873_v38 = vadd.f32 %v796_v16, %v2835_v35  ;;  %v870_v18 = vadd.f32 %v791_v27, %v2836_v15  ;;  %v871_v42 = vadd.f32 %v791_v27, %v2837_v52 }
 0x167   :  { %v1167_v46 = vmin.f32 %v1165_v28, %v2470_v57  ;;  %v1168_v56 = vmin.f32 %v1166_v37, %v2473_v4  ;;  %v2838_v4 = vld [vmem:[#allocation21_spill] sm:$0xff] }
 0x168   :  { %v940_v45 = vadd.f32 %v2248_v10, %v870_v18  ;;  %v941_v30 = vadd.f32 %v2250_v8, %v871_v42  ;;  %v942_v58 = vadd.f32 %v2248_v10, %v872_v40  ;;  %v943_v51 = vadd.f32 %v2250_v8, %v873_v38 }
 0x16a   :  { %v978_v1 = vmin.f32 %v940_v45, %v941_v30  ;;  %v1169_v44 = vmin.f32 %v1167_v46, %v940_v45  ;;  %v1170_v47 = vmin.f32 %v1168_v56, %v941_v30  ;;  %v979_v7 = vmin.f32 %v942_v58, %v943_v51 }
 0x16c   :  { %1285 = vmin.xlane.f32.xlu2 %v976_v49  ;;  %1289 = vmin.xlane.f32.xlu1 %v978_v1  ;;  %v1171_v41 = vmin.f32 %v1169_v44, %v942_v58  ;;  %v1172_v2 = vmin.f32 %v1170_v47, %v943_v51 }
 0x16d   :  { %v811_v59 = vpop.permute.xlu1 %810  ;;  %1293 = vmin.xlane.f32.xlu0 %v980_v53  ;;  %v806_v57 = vpop.permute.xlu0 %805 }
 0x16e   :  { %v878_v12 = vadd.f32 %v811_v59, %v2838_v4  ;;  %v879_v60 = vadd.f32 %v811_v59, %v2839_v62  ;;  %v876_v22 = vadd.f32 %v806_v57, %v2336_v5  ;;  %v877_v3 = vadd.f32 %v806_v57, %v2338_v55  ;;  %v1305_v59 = vld [vmem:[%s2796_s3 + $0x20] sm:$0xff]  ;;  %v1303_v57 = vld [vmem:[%s2796_s3 + $0x10] sm:$0xff]  ;;  %v1306_v4 = vld [vmem:[%s2796_s3 + $0x28] sm:$0xff] }
 0x16f   :  { %v1173_v20 = vmin.f32 %v1171_v41, %v2493_v13  ;;  %v1174_v24 = vmin.f32 %v1172_v2, %v2496_v29  ;;  %v1302_v41 = vld [vmem:[%s2796_s3 + $0x8] sm:$0xff]  ;;  %v1301_v2 = vld [vmem:[%s2796_s3] sm:$0xff]  ;;  %vm1337_vm4 = vcmp.gt.f32.partialorder %v1305_v59, 0.0  ;;  %vm1335_vm5 = vcmp.gt.f32.partialorder %v1303_v57, 0.0  ;;  %v1324_v59 = vld [vmem:[%s2796_s3 + $0xb8] sm:$0xff] }
 0x170   :  { %v946_v25 = vadd.f32 %v2248_v10, %v876_v22  ;;  %v947_v61 = vadd.f32 %v2250_v8, %v877_v3  ;;  %v948_v36 = vadd.f32 %v2248_v10, %v878_v12  ;;  %v949_v53 = vadd.f32 %v2250_v8, %v879_v60  ;;  %v1307_v12 = vld [vmem:[%s2796_s3 + $0x30] sm:$0xff]  ;;  %v1304_v22 = vld [vmem:[%s2796_s3 + $0x18] sm:$0xff] }
 0x171   :  { %vm1334_vm2 = vcmp.gt.f32.partialorder %v1302_v41, 0.0  ;;  %vm1333_vm3 = vcmp.gt.f32.partialorder %v1301_v2, 0.0  ;;  %vm1338_vm7 = vcmp.gt.f32.partialorder %v1306_v4, 0.0  ;;  %vm1339_vm8 = vcmp.gt.f32.partialorder %v1307_v12, 0.0 }
 0x172   :  { %v981_v54 = vmin.f32 %v946_v25, %v947_v61  ;;  %v1175_v0 = vmin.f32 %v1173_v20, %v946_v25  ;;  %v1176_v33 = vmin.f32 %v1174_v24, %v947_v61  ;;  %v982_v39 = vmin.f32 %v948_v36, %v949_v53  ;;  %v1308_v20 = vld [vmem:[%s2796_s3 + $0x38] sm:$0xff]  ;;  %v1309_v24 = vld [vmem:[%s2796_s3 + $0x40] sm:$0xff]  ;;  %v1311_v25 = vld [vmem:[%s2796_s3 + $0x50] sm:$0xff] }
 0x173   :  { %v1310_v61 = vld [vmem:[%s2796_s3 + $0x48] sm:$0xff]  ;;  %vm1336_vm9 = vcmp.gt.f32.partialorder %v1304_v22, 0.0  ;;  %vm1340_vm10 = vcmp.gt.f32.partialorder %v1308_v20, 0.0  ;;  %vm1341_vm11 = vcmp.gt.f32.partialorder %v1309_v24, 0.0  ;;  %vm1343_vm12 = vcmp.gt.f32.partialorder %v1311_v25, 0.0 }
 0x174   :  { %1291 = vmin.xlane.f32.xlu2 %v979_v7  ;;  %1295 = vmin.xlane.f32.xlu1 %v981_v54  ;;  %v1177_v5 = vmin.f32 %v1175_v0, %v948_v36  ;;  %v1178_v55 = vmin.f32 %v1176_v33, %v949_v53  ;;  %v1312_v36 = vld [vmem:[%s2796_s3 + $0x58] sm:$0xff]  ;;  %v1314_v33 = vld [vmem:[%s2796_s3 + $0x68] sm:$0xff]  ;;  %vm1342_vm13 = vcmp.gt.f32.partialorder %v1310_v61, 0.0 }
 0x175   :  { %1299 = vmin.xlane.f32.xlu0 %v983_v50  ;;  %vm1344_vm14 = vcmp.gt.f32.partialorder %v1312_v36, 0.0  ;;  %vm1346_vm15 = vcmp.gt.f32.partialorder %v1314_v33, 0.0 }
 0x176   :  { %v1179_v13 = vmin.f32 %v1177_v5, %v2516_v23  ;;  %v1180_v29 = vmin.f32 %v1178_v55, %v2519_v9  ;;  %v1313_v5 = vld [vmem:[%s2796_s3 + $0x60] sm:$0xff]  ;;  %v1315_v55 = vld [vmem:[%s2796_s3 + $0x70] sm:$0xff] }
 0x178   :  { %v1479_v43 = vrot.slane %v1179_v13, 4  ;;  %v1485_v10 = vrot.slane %v1180_v29, 4 }
 0x17a   :  { %v1480_v63 = vmin.f32 %v1179_v13, %v1479_v43  ;;  %v1486_v8 = vmin.f32 %v1180_v29, %v1485_v10  ;;  %v1317_v43 = vld [vmem:[%s2796_s3 + $0x80] sm:$0xff] }
 0x17c   :  { %1297 = vmin.xlane.f32.xlu2 %v982_v39  ;;  %v1481_v11 = vrot.slane %v1480_v63, 2  ;;  %v1487_v6 = vrot.slane %v1486_v8, 2 }
 0x17e   :  { %v1482_v21 = vmin.f32 %v1480_v63, %v1481_v11  ;;  %v1488_v34 = vmin.f32 %v1486_v8, %v1487_v6  ;;  %v1316_v11 = vld [vmem:[%s2796_s3 + $0x78] sm:$0xff]  ;;  %v1318_v6 = vld [vmem:[%s2796_s3 + $0x88] sm:$0xff] }
 0x180   :  { %v1483_v31 = vrot.slane %v1482_v21, 1  ;;  %v1489_v14 = vrot.slane %v1488_v34, 1 }
 0x182   :  { %v1490_v50 = vmin.f32 %v1488_v34, %v1489_v14  ;;  %v1484_v23 = vmin.f32 %v1482_v21, %v1483_v31  ;;  %v2666_v31 = vld [vmem:[%s2796_s3 + $0x98] sm:$0xff] }
 0x184   :  { %v1495_v9 = vrot.slane %v1490_v50, 7 }
 0x186   :  { %v1497_v26 = vsel %vm1496_vm0, %v1484_v23, %v1495_v9 }
 0x187   :  { %v1499_v19 = vsel %vm1492_vm1, %v1497_v26, -inf  ;;  %vm1347_vm1 = vcmp.gt.f32.partialorder %v1315_v55, 0.0  ;;  %v1329_v55 = vld [vmem:[%s2796_s3 + $0xe0] sm:$0xff] }
 0x188   :  { %v1501_v48 = vperm.slane %v1499_v19, 0  ;;  %v1502_v49 = vperm.slane %v1499_v19, 1 }
 0x18a   :  { %v1505_v28 = vsel %vm1496_vm0, %v1501_v48, -inf  ;;  %v1506_v37 = vsel %vm1496_vm0, %v1502_v49, -inf  ;;  %vm1345_vm0 = vcmp.gt.f32.partialorder %v1313_v5, 0.0 }
 0x18b   :  { %v1507_v16 = vmax.f32 %v1505_v28, %v1506_v37 }
 0x18d   :  { %1508 = vmax.xlane.f32.xlu1 %v1507_v16  ;;  %v1319_v16 = vld [vmem:[%s2796_s3 + $0x90] sm:$0xff] }
 0x198   :  { %v1238_v27 = vpop.xlane.xlu0 %1237  ;;  %v1240_v32 = vpop.xlane.xlu1 %1239 }
 0x199   :  { %v1366_v53 = vsel %vm1334_vm2, %v1240_v32, -inf  ;;  %v1365_v54 = vsel %vm1333_vm3, %v1238_v27, -inf  ;;  %vm1349_vm2 = vcmp.gt.f32.partialorder %v1317_v43, 0.0  ;;  %vm1348_vm3 = vcmp.gt.f32.partialorder %v1316_v11, 0.0  ;;  %v1330_v11 = vld [vmem:[%s2796_s3 + $0xe8] sm:$0xff] }
 0x19a   :  { %v1399_v10 = vsel %vm1397_vm6, %v1366_v53, -inf  ;;  %v1398_v63 = vsel %vm1397_vm6, %v1365_v54, -inf  ;;  %v1325_v54 = vld [vmem:[%s2796_s3 + $0xc0] sm:$0xff] }
 0x19f   :  { %v1242_v40 = vpop.xlane.xlu2 %1241 }
 0x1a0   :  { %v1246_v35 = vpop.xlane.xlu0 %1245  ;;  %v1367_v39 = vsel %vm1335_vm5, %v1242_v40, -inf  ;;  %vm1352_vm5 = vcmp.gt.f32.partialorder %v2666_v31, 0.0 }
 0x1a1   :  { %v1369_v0 = vsel %vm1337_vm4, %v1246_v35, -inf  ;;  %v1400_v21 = vsel %vm1397_vm6, %v1367_v39, -inf  ;;  %vm1350_vm4 = vcmp.gt.f32.partialorder %v1318_v6, 0.0 }
 0x1a2   :  { %v1402_v8 = vsel %vm1397_vm6, %v1369_v0, -inf }
 0x1a3   :  { %v1403_v19 = vmax.f32 %v1398_v63, %v1402_v8 }
 0x1a7   :  { %v1244_v38 = vpop.xlane.xlu2 %1243  ;;  %v1248_v15 = vpop.xlane.xlu1 %1247 }
 0x1a8   :  { %v2574_v18 = vpop.xlane.xlu0 %1251  ;;  %v1370_v13 = vsel %vm1338_vm7, %v1248_v15, -inf  ;;  %v1368_v34 = vsel %vm1336_vm9, %v1244_v38, -inf  ;;  %v1321_v38 = vld [vmem:[%s2796_s3 + $0xa0] sm:$0xff]  ;;  %v2698_v15 = vld [vmem:[%s2796_s3 + $0xb0] sm:$0xff]  ;;  %vm36_vm7 = vcmask 0  }
 0x1a9   :  { %v1404_v50 = vsel %vm1397_vm6, %v1370_v13, -inf  ;;  %v1372_v23 = vsel %vm1340_vm10, %v2574_v18, -inf  ;;  %v1401_v49 = vsel %vm1397_vm6, %v1368_v34, -inf  ;;  %vm1353_vm9 = vcmp.gt.f32.partialorder %v1321_v38, 0.0 }
 0x1aa   :  { %v1405_v27 = vmax.f32 %v1399_v10, %v1404_v50  ;;  %v1408_v32 = vsel %vm1397_vm6, %v1372_v23, -inf  ;;  %vm1355_vm10 = vcmp.gt.f32.partialorder %v2698_v15, 0.0 }
 0x1ab   :  { %v1409_v41 = vmax.f32 %v1401_v49, %v1408_v32 }
 0x1af   :  { %v1250_v52 = vpop.xlane.xlu2 %1249  ;;  %v2576_v42 = vpop.xlane.xlu1 %1253 }
 0x1b0   :  { %v2578_v46 = vpop.xlane.xlu0 %1257  ;;  %v1371_v29 = vsel %vm1339_vm8, %v1250_v52, -inf  ;;  %v1373_v28 = vsel %vm1341_vm11, %v2576_v42, -inf  ;;  %vm1351_vm8 = vcmp.gt.f32.partialorder %v1319_v16, 0.0 }
 0x1b1   :  { %v1406_v9 = vsel %vm1397_vm6, %v1371_v29, -inf  ;;  %v1375_v37 = vsel %vm1343_vm12, %v2578_v46, -inf  ;;  %v1410_v42 = vsel %vm1397_vm6, %v1373_v28, -inf  ;;  %vm1356_vm12 = vcmp.gt.f32.partialorder %v1324_v59, 0.0 }
 0x1b2   :  { %v1407_v40 = vmax.f32 %v1400_v21, %v1406_v9  ;;  %v1414_v46 = vsel %vm1397_vm6, %v1375_v37, -inf  ;;  %v1411_v25 = vmax.f32 %v1403_v19, %v1410_v42 }
 0x1b4   :  { %v1415_v61 = vmax.f32 %v1407_v40, %v1414_v46 }
 0x1b7   :  { %v2580_v56 = vpop.xlane.xlu2 %1255  ;;  %v2582_v45 = vpop.xlane.xlu1 %1259 }
 0x1b8   :  { %v2584_v30 = vpop.xlane.xlu0 %1263  ;;  %v1374_v48 = vsel %vm1342_vm13, %v2580_v56, -inf  ;;  %v1376_v35 = vsel %vm1344_vm14, %v2582_v45, -inf  ;;  %v1582_v45 = vmov -inf   ;;  %vm1357_vm14 = vcmp.gt.f32.partialorder %v1325_v54, 0.0 }
 0x1b9   :  { %v1412_v18 = vsel %vm1397_vm6, %v1374_v48, -inf  ;;  %v1378_v56 = vsel %vm1346_vm15, %v2584_v30, -inf  ;;  %37 = vst.msk [vmem:[#allocation4] sm:$0x1] %vm36_vm7, %v1582_v45  ;;  %v1416_v2 = vsel %vm1397_vm6, %v1376_v35, -inf  ;;  %v1326_v30 = vld [vmem:[%s2796_s3 + $0xc8] sm:$0xff] }
 0x1ba   :  { %v1413_v57 = vmax.f32 %v1405_v27, %v1412_v18  ;;  %v1420_v36 = vsel %vm1397_vm6, %v1378_v56, -inf  ;;  %vm1358_vm13 = vcmp.gt.f32.partialorder %v1326_v30, 0.0  ;;  %v1417_v33 = vmax.f32 %v1409_v41, %v1416_v2 }
 0x1bc   :  { %v1421_v13 = vmax.f32 %v1413_v57, %v1420_v36 }
 0x1bf   :  { %v2586_v58 = vpop.xlane.xlu2 %1261  ;;  %v2588_v51 = vpop.xlane.xlu1 %1265 }
 0x1c0   :  { %v2590_v1 = vpop.xlane.xlu0 %1269  ;;  %v1377_v52 = vsel %vm1345_vm0, %v2586_v58, -inf  ;;  %v1322_v58 = vld [vmem:[%s2796_s3 + $0xa8] sm:$0xff]  ;;  %v1379_v12 = vsel %vm1347_vm1, %v2588_v51, -inf  ;;  %vm1361_vm0 = vcmp.gt.f32.partialorder %v1329_v55, 0.0 }
 0x1c1   :  { %v1418_v4 = vsel %vm1397_vm6, %v1377_v52, -inf  ;;  %v1381_v53 = vsel %vm1349_vm2, %v2590_v1, -inf  ;;  %vm1354_vm11 = vcmp.gt.f32.partialorder %v1322_v58, 0.0  ;;  %v1422_v5 = vsel %vm1397_vm6, %v1379_v12, -inf }
 0x1c2   :  { %v1419_v39 = vmax.f32 %v1411_v25, %v1418_v4  ;;  %v1426_v29 = vsel %vm1397_vm6, %v1381_v53, -inf  ;;  %v1423_v6 = vmax.f32 %v1415_v61, %v1422_v5  ;;  %vm1362_vm2 = vcmp.gt.f32.partialorder %v1330_v11, 0.0 }
 0x1c4   :  { %v1427_v34 = vmax.f32 %v1419_v39, %v1426_v29 }
 0x1c7   :  { %v2592_v44 = vpop.xlane.xlu2 %1267  ;;  %v2594_v47 = vpop.xlane.xlu1 %1271 }
 0x1c8   :  { %v2596_v7 = vpop.xlane.xlu0 %1275  ;;  %v1380_v22 = vsel %vm1348_vm3, %v2592_v44, -inf  ;;  %v1382_v51 = vsel %vm1350_vm4, %v2594_v47, -inf  ;;  %v1327_v44 = vld [vmem:[%s2796_s3 + $0xd0] sm:$0xff]  ;;  %v1328_v47 = vld [vmem:[%s2796_s3 + $0xd8] sm:$0xff] }
 0x1c9   :  { %v1424_v1 = vsel %vm1397_vm6, %v1380_v22, -inf  ;;  %v1384_v43 = vsel %vm1352_vm5, %v2596_v7, -inf  ;;  %v1428_v10 = vsel %vm1397_vm6, %v1382_v51, -inf  ;;  %vm1359_vm15 = vcmp.gt.f32.partialorder %v1327_v44, 0.0 }
 0x1ca   :  { %v1425_v21 = vmax.f32 %v1417_v33, %v1424_v1  ;;  %vm1360_vm1 = vcmp.gt.f32.partialorder %v1328_v47, 0.0  ;;  %v1432_v7 = vsel %vm1397_vm6, %v1384_v43, -inf  ;;  %v1429_v50 = vmax.f32 %v1421_v13, %v1428_v10  ;;  %v1467_v13 = vld [vmem:[#allocation4] sm:$0x1] }
 0x1cc   :  { %v1433_v37 = vmax.f32 %v1425_v21, %v1432_v7 }
 0x1cf   :  { %v2616_v62 = vpop.xlane.xlu2 %1273  ;;  %v2618_v60 = vpop.xlane.xlu1 %1277 }
 0x1d0   :  { %v2623_v3 = vpop.xlane.xlu0 %1281  ;;  %v1383_v63 = vsel %vm1351_vm8, %v2616_v62, -inf  ;;  %v1385_v31 = vsel %vm1353_vm9, %v2618_v60, -inf }
 0x1d1   :  { %v1430_v23 = vsel %vm1397_vm6, %v1383_v63, -inf  ;;  %v1387_v49 = vsel %vm1355_vm10, %v2623_v3, -inf  ;;  %v1434_v16 = vsel %vm1397_vm6, %v1385_v31, -inf  ;;  %v1331_v3 = vld [vmem:[%s2796_s3 + $0xf0] sm:$0xff] }
 0x1d2   :  { %v1431_v40 = vmax.f32 %v1423_v6, %v1430_v23  ;;  %v1435_v46 = vmax.f32 %v1427_v34, %v1434_v16  ;;  %vm1363_vm4 = vcmp.gt.f32.partialorder %v1331_v3, 0.0 }
 0x1d7   :  { %v2668_v14 = vpop.xlane.xlu2 %1279  ;;  %v2670_v17 = vpop.xlane.xlu1 %1283 }
 0x1d8   :  { %v2676_v26 = vpop.xlane.xlu0 %1287  ;;  %v1386_v8 = vsel %vm1354_vm11, %v2668_v14, -inf  ;;  %v1388_v62 = vsel %vm1356_vm12, %v2670_v17, -inf  ;;  %v1332_v14 = vld [vmem:[%s2796_s3 + $0xf8] sm:$0xff]  ;;  %s1583_s3 = smov [#allocation5]  }
 0x1d9   :  { %v1436_v9 = vsel %vm1397_vm6, %v1386_v8, -inf  ;;  %v1390_v60 = vsel %vm1358_vm13, %v2676_v26, -inf  ;;  %v1440_v27 = vsel %vm1397_vm6, %v1388_v62, -inf  ;;  %vm1364_vm3 = vcmp.gt.f32.partialorder %v1332_v14, 0.0  ;;  %s1536_s17 = sshll.u32 %s1583_s3, 4  ;;  %s1537_s17 = int_to_ptr.vmem [resolvable:$true] %s1536_s17 }
 0x1da   :  { %v1437_v35 = vmax.f32 %v1429_v50, %v1436_v9  ;;  %v1438_v26 = vsel %vm1397_vm6, %v1387_v49, -inf  ;;  %v1444_v15 = vsel %vm1397_vm6, %v1390_v60, -inf  ;;  %v1441_v56 = vmax.f32 %v1433_v37, %v1440_v27 }
 0x1db   :  { %v1439_v59 = vmax.f32 %v1431_v40, %v1438_v26 }
 0x1dc   :  { %v1445_v30 = vmax.f32 %v1437_v35, %v1444_v15 }
 0x1df   :  { %v1286_v20 = vpop.xlane.xlu2 %1285  ;;  %v1290_v24 = vpop.xlane.xlu1 %1289 }
 0x1e0   :  { %v1294_v0 = vpop.xlane.xlu0 %1293  ;;  %v1389_v17 = vsel %vm1357_vm14, %v1286_v20, -inf  ;;  %v1391_v38 = vsel %vm1359_vm15, %v1290_v24, -inf }
 0x1e1   :  { %v1442_v52 = vsel %vm1397_vm6, %v1389_v17, -inf  ;;  %v1393_v45 = vsel %vm1361_vm0, %v1294_v0, -inf  ;;  %v1446_v2 = vsel %vm1397_vm6, %v1391_v38, -inf }
 0x1e2   :  { %v1443_v57 = vmax.f32 %v1435_v46, %v1442_v52  ;;  %v1450_v12 = vsel %vm1397_vm6, %v1393_v45, -inf  ;;  %v1447_v24 = vmax.f32 %v1439_v59, %v1446_v2 }
 0x1e4   :  { %v1451_v53 = vmax.f32 %v1443_v57, %v1450_v12 }
 0x1e7   :  { %v1292_v19 = vpop.xlane.xlu2 %1291  ;;  %v1296_v48 = vpop.xlane.xlu1 %1295 }
 0x1e8   :  { %v1392_v28 = vsel %vm1360_vm1, %v1292_v19, -inf  ;;  %v1300_v32 = vpop.xlane.xlu0 %1299  ;;  %v1394_v18 = vsel %vm1362_vm2, %v1296_v48, -inf }
 0x1e9   :  { %v1448_v42 = vsel %vm1397_vm6, %v1392_v28, -inf  ;;  %v1396_v41 = vsel %vm1364_vm3, %v1300_v32, -inf  ;;  %v1452_v58 = vsel %vm1397_vm6, %v1394_v18, -inf }
 0x1ea   :  { %v1449_v4 = vmax.f32 %v1441_v56, %v1448_v42  ;;  %v1456_v22 = vsel %vm1397_vm6, %v1396_v41, -inf  ;;  %v1453_v25 = vmax.f32 %v1445_v30, %v1452_v58 }
 0x1ec   :  { %v1457_v54 = vmax.f32 %v1449_v4, %v1456_v22  ;;  %v1458_v51 = vmax.f32 %v1451_v53, %v1453_v25 }
 0x1ef   :  { %v1298_v20 = vpop.xlane.xlu2 %1297 }
 0x1f0   :  { %v1395_v61 = vsel %vm1363_vm4, %v1298_v20, -inf }
 0x1f1   :  { %v1454_v36 = vsel %vm1397_vm6, %v1395_v61, -inf }
 0x1f2   :  { %v1455_v0 = vmax.f32 %v1447_v24, %v1454_v36 }
 0x1f4   :  { %v1459_v44 = vmax.f32 %v1455_v0, %v1457_v54 }
 0x1f6   :  { %v1460_v33 = vmax.f32 %v1458_v51, %v1459_v44 }
 0x1f8   :  { %v1461_v39 = vrot.slane %v1460_v33, 4 }
 0x1fa   :  { %v1462_v5 = vmax.f32 %v1460_v33, %v1461_v39 }
 0x1fc   :  { %v1463_v1 = vrot.slane %v1462_v5, 2 }
 0x1fe   :  { %v1464_v55 = vmax.f32 %v1462_v5, %v1463_v1 }
 0x200   :  { %v1465_v47 = vrot.slane %v1464_v55, 1  ;;  %v1509_v10 = vpop.xlane.xlu1 %1508 }
 0x202   :  { %v1466_v29 = vmax.f32 %v1464_v55, %v1465_v47 }
 0x204   :  { %v1468_v43 = vmax.f32 %v1467_v13, %v1466_v29 }
 0x206   :  { %1470 = vst.msk [vmem:[#allocation4] sm:$0x1] %vm36_vm7, %v1468_v43 }
 0x20d   :  { %v1510_v63 = vld [vmem:[#allocation4] sm:$0x1] }
 0x20e   :  { %v1511_v8 = vmax.f32 %v1510_v63, %v1509_v10 }
 0x210   :  { %1513 = vst.msk [vmem:[#allocation4] sm:$0x1] %vm36_vm7, %v1511_v8 }
 0x217   :  { %v1516_v11 = vld [vmem:[#allocation4] sm:$0x1] }
 0x218   :  { %1553 = vrsqrt.f32 %v1516_v11  ;;  %vm1524_vm6 = vcmp.eq.f32.partialorder %v1516_v11, inf  ;;  %v1527_v50 = vand.u32 2147483648, %v1516_v11  ;;  %vm1526_vm5 = vcmp.eq.f32.partialorder %v1516_v11, 0.0 }
 0x21e   :  { %v1554_v6 = vpop.eup %1553 }
 0x21f   :  { %v1518_v21 = vmul.f32 %v1554_v6, %v1516_v11 }
 0x221   :  { %v1519_v34 = vmul.f32 %v1554_v6, %v1518_v21 }
 0x223   :  { %v1520_v7 = vmul.f32 0.5, %v1519_v34 }
 0x225   :  { %v1521_v31 = vsub.f32 1.5, %v1520_v7 }
 0x227   :  { %v1522_v62 = vmul.f32 %v1554_v6, %v1521_v31 }
 0x229   :  { %v1523_v14 = vmul.f32 %v1522_v62, %v1516_v11 }
 0x22b   :  { %v1525_v23 = vsel %vm1524_vm6, %v1516_v11, %v1523_v14 }
 0x22c   :  { %v1528_v9 = vsel %vm1526_vm5, %v1527_v50, %v1525_v23 }
 0x22d   :  { %1530 = vst.msk [vmem:[#allocation5] sm:$0x1] %vm36_vm7, %v1528_v9 }
 0x22e   :  { %1541 = dma.vmem_to_hbm [thread:$0]  %s1537_s17, 16, %s1539_s20, [#allocation6]  }
 0x22f   :  { %1579 = dma.done.wait [#allocation6], 16  }
 0x230   :  { %1580 = vsyncadd [#allocation6], 4294967280 }
 0x231   :  { %1546 = vsyncpa [#allocation6], 1 }

</bundles_post_ra>
